<compile_context>
chip_gen: v7x
topology: tpu7x:2x2x1
jax: 0.10.0
libtpu: 0.0.40
codegen_flags: <defaults>
</compile_context>

<pallas_src>
import functools

import numpy as np

import jax
import jax.numpy as jnp
from jax.experimental import pallas as pl
from jax.experimental.pallas import tpu as pltpu


_R1 = 28  # conv1 rows computed per image (valid output height of conv1)
_R2 = 19  # conv2 rows computed (valid conv2 rows live at even indices 0..18)


# ---------------------------------------------------------------------------
# Fused kernel: one grid step == one image.
# ---------------------------------------------------------------------------
def _lenet5_kernel(x_ref, m1_ref, b1_ref, m2_ref, b2_ref,
                   w1p_ref, bf1_ref, w2t_ref, bf2_ref, w3t_ref, bf3_ref,
                   out_ref, z1_ref, z2_ref):
    f32 = jnp.float32

    # Scratch is uninitialized VMEM; unwritten rows are never read, but
    # zeroing costs only a few vector stores and removes any doubt.
    z1_ref[...] = jnp.zeros(z1_ref.shape, f32)
    z2_ref[...] = jnp.zeros(z2_ref.shape, f32)

    # ---- conv1 (+bias), width-direction half of the 2x2 pool folded in ----
    # acc1[r, par*128 + co*16 + pw] = conv1[co, r, 2*pw + par] + b1[co]
    acc1 = jnp.zeros((_R1, 256), f32)
    for ci in range(3):
        for i in range(5):
            lhs = x_ref[0, ci, i:i + _R1, :]                       # (28, 32)
            acc1 = acc1 + jnp.dot(lhs, m1_ref[ci * 5 + i],
                                  preferred_element_type=f32)
    acc1 = acc1 + b1_ref[...]                                      # (1, 256)
    # max over even/odd columns (aligned 128-lane halves).
    z1_ref[0:_R1, :] = jnp.maximum(acc1[:, 0:128], acc1[:, 128:256])

    # ---- conv2 (+bias); pool1's height-max + ReLU fused into the reads ----
    acc2 = jnp.zeros((_R2, 256), f32)
    for i2 in range(5):
        s = 2 * i2
        a = jnp.maximum(z1_ref[s:s + _R2, :], z1_ref[s + 1:s + 1 + _R2, :])
        a = jnp.maximum(a, 0.0)                                    # ReLU(pool1)
        acc2 = acc2 + jnp.dot(a, m2_ref[i2], preferred_element_type=f32)
    acc2 = acc2 + b2_ref[...]
    z2_ref[0:_R2, :] = jnp.maximum(acc2[:, 0:128], acc2[:, 128:256])

    # ---- fc1 (pool2's height-max + ReLU fused into the row gather) --------
    h = jnp.zeros((1, 120), f32)
    for qh in range(5):
        r = 4 * qh
        a = jnp.maximum(z2_ref[r:r + 1, :], z2_ref[r + 2:r + 3, :])
        a = jnp.maximum(a, 0.0)                                    # (1, 128)
        h = h + jnp.dot(a, w1p_ref[qh], preferred_element_type=f32)
    h = jnp.maximum(h + bf1_ref[...], 0.0)                         # (1, 120)

    # ---- fc2 -> relu, fc3 --------------------------------------------------
    h = jnp.maximum(
        jnp.dot(h, w2t_ref[...], preferred_element_type=f32) + bf2_ref[...],
        0.0)                                                       # (1, 84)
    out_ref[0] = (jnp.dot(h, w3t_ref[...], preferred_element_type=f32)
                  + bf3_ref[...])                                  # (1, 10)


# ---------------------------------------------------------------------------
# Wrapper
# ---------------------------------------------------------------------------
def lenet5_forward(x, prepared):
    """x: (B, 3, 32, 32) f32 NCHW -> (B, 10) f32 logits."""
    B = x.shape[0]
    out = pl.pallas_call(
        _lenet5_kernel,
        out_shape=jax.ShapeDtypeStruct((B, 1, 10), jnp.float32),
        grid=(B,),
        in_specs=[
            pl.BlockSpec((1, 3, 32, 32), lambda b: (b, 0, 0, 0)),   # x
            pl.BlockSpec((15, 32, 256), lambda b: (0, 0, 0)),       # m1
            pl.BlockSpec((1, 256), lambda b: (0, 0)),               # bias1 lanes
            pl.BlockSpec((5, 128, 256), lambda b: (0, 0, 0)),       # m2
            pl.BlockSpec((1, 256), lambda b: (0, 0)),               # bias2 lanes
            pl.BlockSpec((5, 128, 120), lambda b: (0, 0, 0)),       # fc1 (perm)
            pl.BlockSpec((1, 120), lambda b: (0, 0)),               # fc1 bias
            pl.BlockSpec((120, 84), lambda b: (0, 0)),              # fc2^T
            pl.BlockSpec((1, 84), lambda b: (0, 0)),                # fc2 bias
            pl.BlockSpec((84, 10), lambda b: (0, 0)),               # fc3^T
            pl.BlockSpec((1, 10), lambda b: (0, 0)),                # fc3 bias
        ],
        out_specs=pl.BlockSpec((1, 1, 10), lambda b: (b, 0, 0)),
        scratch_shapes=[pltpu.VMEM((32, 128), jnp.float32),         # z1
                        pltpu.VMEM((32, 128), jnp.float32)],        # z2
        compiler_params=pltpu.CompilerParams(
            dimension_semantics=("parallel",)),
    )(x, prepared["m1"], prepared["b1"], prepared["m2"], prepared["b2"],
      prepared["w1p"], prepared["bf1"], prepared["w2t"], prepared["bf2"],
      prepared["w3t"], prepared["bf3"])
    return out.reshape(B, 10)


# ---------------------------------------------------------------------------
# One-time host-side weight preprocessing (outside jit).
# ---------------------------------------------------------------------------
def prepare_params(params):
    """Build banded conv GEMM matrices (width-pool folded into their output
    columns), per-lane bias vectors, fc1 column permutation for the kernel's
    lane layout, and pre-transposed fc2/fc3 weights."""
    w1 = np.asarray(params["conv1_w"], np.float32)   # (6, 3, 5, 5)
    b1 = np.asarray(params["conv1_b"], np.float32)   # (6,)
    w2 = np.asarray(params["conv2_w"], np.float32)   # (16, 6, 5, 5)
    b2 = np.asarray(params["conv2_b"], np.float32)   # (16,)
    f1 = np.asarray(params["fc1_w"], np.float32)     # (120, 400)
    f2 = np.asarray(params["fc2_w"], np.float32)     # (84, 120)
    f3 = np.asarray(params["fc3_w"], np.float32)     # (10, 84)

    # conv1: term t = ci*5 + i maps a (28, 32) row-window of input channel ci
    # to output lanes  par*128 + co*16 + pw  (pw = pooled column index,
    # par = parity of the pre-pool column 2*pw + par).
    m1 = np.zeros((15, 32, 256), np.float32)
    for ci in range(3):
        for i in range(5):
            for co in range(6):
                for j in range(5):
                    for par in range(2):
                        for pw in range(16):
                            wi = 2 * pw + par + j
                            if wi < 32:
                                m1[ci * 5 + i, wi,
                                   par * 128 + co * 16 + pw] = w1[co, ci, i, j]
    b1l = np.zeros((1, 256), np.float32)
    for par in range(2):
        for co in range(6):
            b1l[0, par * 128 + co * 16: par * 128 + co * 16 + 16] = b1[co]

    # conv2: term i2 maps the 128-lane pooled conv1 activation
    # (lane = ci*16 + pw) to output lanes  par*128 + co2*8 + qw.
    m2 = np.zeros((5, 128, 256), np.float32)
    for i2 in range(5):
        for co2 in range(16):
            for ci in range(6):
                for j2 in range(5):
                    for par in range(2):
                        for qw in range(8):
                            wi = 2 * qw + par + j2
                            if wi < 16:
                                m2[i2, ci * 16 + wi,
                                   par * 128 + co2 * 8 + qw] = w2[co2, ci, i2, j2]
    b2l = np.zeros((1, 256), np.float32)
    for par in range(2):
        for co2 in range(16):
            b2l[0, par * 128 + co2 * 8: par * 128 + co2 * 8 + 8] = b2[co2]

    # fc1: permute columns so the kernel consumes its (co2*8 + qw) lane layout
    # directly (torch flatten order is c*25 + h*5 + w).
    w1p = np.zeros((5, 128, 120), np.float32)
    for qh in range(5):
        for co2 in range(16):
            for qw in range(5):
                w1p[qh, co2 * 8 + qw, :] = f1[:, co2 * 25 + qh * 5 + qw]

    return {
        "m1": jnp.asarray(m1), "b1": jnp.asarray(b1l),
        "m2": jnp.asarray(m2), "b2": jnp.asarray(b2l),
        "w1p": jnp.asarray(w1p),
        "bf1": jnp.asarray(np.asarray(params["fc1_b"], np.float32)[None, :]),
        "w2t": jnp.asarray(np.ascontiguousarray(f2.T)),
        "bf2": jnp.asarray(np.asarray(params["fc2_b"], np.float32)[None, :]),
        "w3t": jnp.asarray(np.ascontiguousarray(f3.T)),
        "bf3": jnp.asarray(np.asarray(params["fc3_b"], np.float32)[None, :]),
    }


# ---------------------------------------------------------------------------
# Parameters (PyTorch LeNet5 shapes) and pure-JAX reference for validation.
# ---------------------------------------------------------------------------
def init_params(key):
    ks = jax.random.split(key, 10)

    def w(k, shape, scale=0.05):
        return (scale * jax.random.normal(k, shape)).astype(jnp.float32)

    return {
        "conv1_w": w(ks[0], (6, 3, 5, 5)),
        "conv1_b": w(ks[1], (6,)),
        "conv2_w": w(ks[2], (16, 6, 5, 5)),
        "conv2_b": w(ks[3], (16,)),
        "fc1_w": w(ks[4], (120, 16 * 5 * 5)),   # torch Linear: (out, in)
        "fc1_b": w(ks[5], (120,)),
        "fc2_w": w(ks[6], (84, 120)),
        "fc2_b": w(ks[7], (84,)),
        "fc3_w": w(ks[8], (10, 84)),
        "fc3_b": w(ks[9], (10,)),
    }


def lenet5_reference(x, params):
    """Pure-JAX reference matching the PyTorch module."""
    hp = jax.lax.Precision.HIGHEST

    def conv(x, w, b):
        y = jax.lax.conv_general_dilated(
            x, w, window_strides=(1, 1), padding="VALID",
            dimension_numbers=("NCHW", "OIHW", "NCHW"), precision=hp)
        return y + b[None, :, None, None]

    def pool(x):
        taps = [x[:, :, di::2, dj::2] for di in (0, 1) for dj in (0, 1)]
        return functools.reduce(jnp.maximum, taps)

    x = jax.nn.relu(pool(conv(x, params["conv1_w"], params["conv1_b"])))
    x = jax.nn.relu(pool(conv(x, params["conv2_w"], params["conv2_b"])))
    x = x.reshape(x.shape[0], -1)
    x = jax.nn.relu(jnp.dot(x, params["fc1_w"].T, precision=hp) + params["fc1_b"])
    x = jax.nn.relu(jnp.dot(x, params["fc2_w"].T, precision=hp) + params["fc2_b"])
    return jnp.dot(x, params["fc3_w"].T, precision=hp) + params["fc3_b"]


if __name__ == "__main__":
    key = jax.random.PRNGKey(0)
    k_x, k_p = jax.random.split(key)

    # LeNet5's fc1 (16*5*5) pins the input spatial size to 3x32x32.
    batch = 2
    x = jax.random.normal(k_x, (batch, 3, 32, 32), dtype=jnp.float32)
    params = init_params(k_p)
    prepared = prepare_params(params)          # one-time host-side reshuffle

    fwd = jax.jit(lenet5_forward)
    out = fwd(x, prepared)
    jax.block_until_ready(out)

    assert out.shape == (batch, 10), out.shape
    assert out.dtype == jnp.float32, out.dtype

    ref = np.asarray(lenet5_reference(x, params))
    got = np.asarray(out)
    if not np.allclose(got, ref, rtol=1e-2, atol=1e-2):
        max_err = float(np.max(np.abs(got - ref)))
        raise AssertionError(f"kernel mismatch vs reference, max|err|={max_err}")

    print("KERNEL_OK")
</pallas_src>

<mosaic_0001>
module attributes {stable_mosaic.version = 11 : i64} {
  func.func @_lenet5_kernel(%arg0: i32, %arg1: memref<1x3x32x32xf32, #tpu.memory_space<vmem>>, %arg2: memref<15x32x256xf32, #tpu.memory_space<vmem>>, %arg3: memref<1x256xf32, #tpu.memory_space<vmem>>, %arg4: memref<5x128x256xf32, #tpu.memory_space<vmem>>, %arg5: memref<1x256xf32, #tpu.memory_space<vmem>>, %arg6: memref<5x128x120xf32, #tpu.memory_space<vmem>>, %arg7: memref<1x120xf32, #tpu.memory_space<vmem>>, %arg8: memref<120x84xf32, #tpu.memory_space<vmem>>, %arg9: memref<1x84xf32, #tpu.memory_space<vmem>>, %arg10: memref<84x10xf32, #tpu.memory_space<vmem>>, %arg11: memref<1x10xf32, #tpu.memory_space<vmem>>, %arg12: memref<1x1x10xf32, #tpu.memory_space<vmem>>, %arg13: memref<32x128xf32, #tpu.memory_space<vmem>>, %arg14: memref<32x128xf32, #tpu.memory_space<vmem>>) attributes {dimension_semantics = [#tpu.dimension_semantics<parallel>], iteration_bounds = array<i64: 2>, scalar_prefetch = 0 : i64, scratch_operands = 2 : i64, tpu.core_type = #tpu.core_type<tc>, window_params = [{transform_indices = @transform_0, window_bounds = array<i64: 1, 3, 32, 32>}, {pipeline_mode = #tpu.pipeline_mode<synchronous>, transform_indices = @transform_1, window_bounds = array<i64: 15, 32, 256>}, {pipeline_mode = #tpu.pipeline_mode<synchronous>, transform_indices = @transform_2, window_bounds = array<i64: 1, 256>}, {pipeline_mode = #tpu.pipeline_mode<synchronous>, transform_indices = @transform_3, window_bounds = array<i64: 5, 128, 256>}, {pipeline_mode = #tpu.pipeline_mode<synchronous>, transform_indices = @transform_4, window_bounds = array<i64: 1, 256>}, {pipeline_mode = #tpu.pipeline_mode<synchronous>, transform_indices = @transform_5, window_bounds = array<i64: 5, 128, 120>}, {pipeline_mode = #tpu.pipeline_mode<synchronous>, transform_indices = @transform_6, window_bounds = array<i64: 1, 120>}, {pipeline_mode = #tpu.pipeline_mode<synchronous>, transform_indices = @transform_7, window_bounds = array<i64: 120, 84>}, {pipeline_mode = #tpu.pipeline_mode<synchronous>, transform_indices = @transform_8, window_bounds = array<i64: 1, 84>}, {pipeline_mode = #tpu.pipeline_mode<synchronous>, transform_indices = @transform_9, window_bounds = array<i64: 84, 10>}, {pipeline_mode = #tpu.pipeline_mode<synchronous>, transform_indices = @transform_10, window_bounds = array<i64: 1, 10>}, {transform_indices = @transform_11, window_bounds = array<i64: 1, 1, 10>}]} {
    %cst = arith.constant 0.000000e+00 : f32
    %0 = vector.broadcast %cst : f32 to vector<32x128xf32>
    %c0 = arith.constant 0 : index
    %c0_0 = arith.constant 0 : index
    %1 = vector.load %arg13[%c0, %c0_0] : memref<32x128xf32, #tpu.memory_space<vmem>>, vector<32x128xf32>
    tpu.vector_store %arg13[%c0, %c0_0], %0 {strides = array<i32>} : memref<32x128xf32, #tpu.memory_space<vmem>>, vector<32x128xf32>,
    %cst_1 = arith.constant 0.000000e+00 : f32
    %2 = vector.broadcast %cst_1 : f32 to vector<32x128xf32>
    %c0_2 = arith.constant 0 : index
    %c0_3 = arith.constant 0 : index
    %3 = vector.load %arg14[%c0_2, %c0_3] : memref<32x128xf32, #tpu.memory_space<vmem>>, vector<32x128xf32>
    tpu.vector_store %arg14[%c0_2, %c0_3], %2 {strides = array<i32>} : memref<32x128xf32, #tpu.memory_space<vmem>>, vector<32x128xf32>,
    %cst_4 = arith.constant 0.000000e+00 : f32
    %4 = vector.broadcast %cst_4 : f32 to vector<28x256xf32>
    %c0_5 = arith.constant 0 : index
    %c0_6 = arith.constant 0 : index
    %c0_7 = arith.constant 0 : index
    %c0_8 = arith.constant 0 : index
    %5 = vector.load %arg1[%c0_5, %c0_6, %c0_7, %c0_8] : memref<1x3x32x32xf32, #tpu.memory_space<vmem>>, vector<1x1x28x32xf32>
    %6 = vector.shape_cast %5 : vector<1x1x28x32xf32> to vector<28x32xf32>
    %c0_9 = arith.constant 0 : index
    %c0_10 = arith.constant 0 : index
    %c0_11 = arith.constant 0 : index
    %7 = vector.load %arg2[%c0_9, %c0_10, %c0_11] : memref<15x32x256xf32, #tpu.memory_space<vmem>>, vector<1x32x256xf32>
    %8 = vector.shape_cast %7 : vector<1x32x256xf32> to vector<32x256xf32>
    %cst_12 = arith.constant dense<0.000000e+00> : vector<28x256xf32>
    %9 = tpu.matmul %6, %8, %cst_12 {dimension_numbers = #tpu.dot_dimension_numbers<[1], [0], [0], [1], [0, 0, 1, 1], [], []>} : vector<28x32xf32>, vector<32x256xf32>, vector<28x256xf32> -> vector<28x256xf32>
    %10 = arith.addf %4, %9 : vector<28x256xf32>
    %c0_13 = arith.constant 0 : index
    %c0_14 = arith.constant 0 : index
    %c1 = arith.constant 1 : index
    %c0_15 = arith.constant 0 : index
    %11 = vector.load %arg1[%c0_13, %c0_14, %c1, %c0_15] : memref<1x3x32x32xf32, #tpu.memory_space<vmem>>, vector<1x1x28x32xf32>
    %12 = vector.shape_cast %11 : vector<1x1x28x32xf32> to vector<28x32xf32>
    %c1_16 = arith.constant 1 : index
    %c0_17 = arith.constant 0 : index
    %c0_18 = arith.constant 0 : index
    %13 = vector.load %arg2[%c1_16, %c0_17, %c0_18] : memref<15x32x256xf32, #tpu.memory_space<vmem>>, vector<1x32x256xf32>
    %14 = vector.shape_cast %13 : vector<1x32x256xf32> to vector<32x256xf32>
    %cst_19 = arith.constant dense<0.000000e+00> : vector<28x256xf32>
    %15 = tpu.matmul %12, %14, %cst_19 {dimension_numbers = #tpu.dot_dimension_numbers<[1], [0], [0], [1], [0, 0, 1, 1], [], []>} : vector<28x32xf32>, vector<32x256xf32>, vector<28x256xf32> -> vector<28x256xf32>
    %16 = arith.addf %10, %15 : vector<28x256xf32>
    %c0_20 = arith.constant 0 : index
    %c0_21 = arith.constant 0 : index
    %c2 = arith.constant 2 : index
    %c0_22 = arith.constant 0 : index
    %17 = vector.load %arg1[%c0_20, %c0_21, %c2, %c0_22] : memref<1x3x32x32xf32, #tpu.memory_space<vmem>>, vector<1x1x28x32xf32>
    %18 = vector.shape_cast %17 : vector<1x1x28x32xf32> to vector<28x32xf32>
    %c2_23 = arith.constant 2 : index
    %c0_24 = arith.constant 0 : index
    %c0_25 = arith.constant 0 : index
    %19 = vector.load %arg2[%c2_23, %c0_24, %c0_25] : memref<15x32x256xf32, #tpu.memory_space<vmem>>, vector<1x32x256xf32>
    %20 = vector.shape_cast %19 : vector<1x32x256xf32> to vector<32x256xf32>
    %cst_26 = arith.constant dense<0.000000e+00> : vector<28x256xf32>
    %21 = tpu.matmul %18, %20, %cst_26 {dimension_numbers = #tpu.dot_dimension_numbers<[1], [0], [0], [1], [0, 0, 1, 1], [], []>} : vector<28x32xf32>, vector<32x256xf32>, vector<28x256xf32> -> vector<28x256xf32>
    %22 = arith.addf %16, %21 : vector<28x256xf32>
    %c0_27 = arith.constant 0 : index
    %c0_28 = arith.constant 0 : index
    %c3 = arith.constant 3 : index
    %c0_29 = arith.constant 0 : index
    %23 = vector.load %arg1[%c0_27, %c0_28, %c3, %c0_29] : memref<1x3x32x32xf32, #tpu.memory_space<vmem>>, vector<1x1x28x32xf32>
    %24 = vector.shape_cast %23 : vector<1x1x28x32xf32> to vector<28x32xf32>
    %c3_30 = arith.constant 3 : index
    %c0_31 = arith.constant 0 : index
    %c0_32 = arith.constant 0 : index
    %25 = vector.load %arg2[%c3_30, %c0_31, %c0_32] : memref<15x32x256xf32, #tpu.memory_space<vmem>>, vector<1x32x256xf32>
    %26 = vector.shape_cast %25 : vector<1x32x256xf32> to vector<32x256xf32>
    %cst_33 = arith.constant dense<0.000000e+00> : vector<28x256xf32>
    %27 = tpu.matmul %24, %26, %cst_33 {dimension_numbers = #tpu.dot_dimension_numbers<[1], [0], [0], [1], [0, 0, 1, 1], [], []>} : vector<28x32xf32>, vector<32x256xf32>, vector<28x256xf32> -> vector<28x256xf32>
    %28 = arith.addf %22, %27 : vector<28x256xf32>
    %c0_34 = arith.constant 0 : index
    %c0_35 = arith.constant 0 : index
    %c4 = arith.constant 4 : index
    %c0_36 = arith.constant 0 : index
    %29 = vector.load %arg1[%c0_34, %c0_35, %c4, %c0_36] : memref<1x3x32x32xf32, #tpu.memory_space<vmem>>, vector<1x1x28x32xf32>
    %30 = vector.shape_cast %29 : vector<1x1x28x32xf32> to vector<28x32xf32>
    %c4_37 = arith.constant 4 : index
    %c0_38 = arith.constant 0 : index
    %c0_39 = arith.constant 0 : index
    %31 = vector.load %arg2[%c4_37, %c0_38, %c0_39] : memref<15x32x256xf32, #tpu.memory_space<vmem>>, vector<1x32x256xf32>
    %32 = vector.shape_cast %31 : vector<1x32x256xf32> to vector<32x256xf32>
    %cst_40 = arith.constant dense<0.000000e+00> : vector<28x256xf32>
    %33 = tpu.matmul %30, %32, %cst_40 {dimension_numbers = #tpu.dot_dimension_numbers<[1], [0], [0], [1], [0, 0, 1, 1], [], []>} : vector<28x32xf32>, vector<32x256xf32>, vector<28x256xf32> -> vector<28x256xf32>
    %34 = arith.addf %28, %33 : vector<28x256xf32>
    %c0_41 = arith.constant 0 : index
    %c1_42 = arith.constant 1 : index
    %c0_43 = arith.constant 0 : index
    %c0_44 = arith.constant 0 : index
    %35 = vector.load %arg1[%c0_41, %c1_42, %c0_43, %c0_44] : memref<1x3x32x32xf32, #tpu.memory_space<vmem>>, vector<1x1x28x32xf32>
    %36 = vector.shape_cast %35 : vector<1x1x28x32xf32> to vector<28x32xf32>
    %c5 = arith.constant 5 : index
    %c0_45 = arith.constant 0 : index
    %c0_46 = arith.constant 0 : index
    %37 = vector.load %arg2[%c5, %c0_45, %c0_46] : memref<15x32x256xf32, #tpu.memory_space<vmem>>, vector<1x32x256xf32>
    %38 = vector.shape_cast %37 : vector<1x32x256xf32> to vector<32x256xf32>
    %cst_47 = arith.constant dense<0.000000e+00> : vector<28x256xf32>
    %39 = tpu.matmul %36, %38, %cst_47 {dimension_numbers = #tpu.dot_dimension_numbers<[1], [0], [0], [1], [0, 0, 1, 1], [], []>} : vector<28x32xf32>, vector<32x256xf32>, vector<28x256xf32> -> vector<28x256xf32>
    %40 = arith.addf %34, %39 : vector<28x256xf32>
    %c0_48 = arith.constant 0 : index
    %c1_49 = arith.constant 1 : index
    %c1_50 = arith.constant 1 : index
    %c0_51 = arith.constant 0 : index
    %41 = vector.load %arg1[%c0_48, %c1_49, %c1_50, %c0_51] : memref<1x3x32x32xf32, #tpu.memory_space<vmem>>, vector<1x1x28x32xf32>
    %42 = vector.shape_cast %41 : vector<1x1x28x32xf32> to vector<28x32xf32>
    %c6 = arith.constant 6 : index
    %c0_52 = arith.constant 0 : index
    %c0_53 = arith.constant 0 : index
    %43 = vector.load %arg2[%c6, %c0_52, %c0_53] : memref<15x32x256xf32, #tpu.memory_space<vmem>>, vector<1x32x256xf32>
    %44 = vector.shape_cast %43 : vector<1x32x256xf32> to vector<32x256xf32>
    %cst_54 = arith.constant dense<0.000000e+00> : vector<28x256xf32>
    %45 = tpu.matmul %42, %44, %cst_54 {dimension_numbers = #tpu.dot_dimension_numbers<[1], [0], [0], [1], [0, 0, 1, 1], [], []>} : vector<28x32xf32>, vector<32x256xf32>, vector<28x256xf32> -> vector<28x256xf32>
    %46 = arith.addf %40, %45 : vector<28x256xf32>
    %c0_55 = arith.constant 0 : index
    %c1_56 = arith.constant 1 : index
    %c2_57 = arith.constant 2 : index
    %c0_58 = arith.constant 0 : index
    %47 = vector.load %arg1[%c0_55, %c1_56, %c2_57, %c0_58] : memref<1x3x32x32xf32, #tpu.memory_space<vmem>>, vector<1x1x28x32xf32>
    %48 = vector.shape_cast %47 : vector<1x1x28x32xf32> to vector<28x32xf32>
    %c7 = arith.constant 7 : index
    %c0_59 = arith.constant 0 : index
    %c0_60 = arith.constant 0 : index
    %49 = vector.load %arg2[%c7, %c0_59, %c0_60] : memref<15x32x256xf32, #tpu.memory_space<vmem>>, vector<1x32x256xf32>
    %50 = vector.shape_cast %49 : vector<1x32x256xf32> to vector<32x256xf32>
    %cst_61 = arith.constant dense<0.000000e+00> : vector<28x256xf32>
    %51 = tpu.matmul %48, %50, %cst_61 {dimension_numbers = #tpu.dot_dimension_numbers<[1], [0], [0], [1], [0, 0, 1, 1], [], []>} : vector<28x32xf32>, vector<32x256xf32>, vector<28x256xf32> -> vector<28x256xf32>
    %52 = arith.addf %46, %51 : vector<28x256xf32>
    %c0_62 = arith.constant 0 : index
    %c1_63 = arith.constant 1 : index
    %c3_64 = arith.constant 3 : index
    %c0_65 = arith.constant 0 : index
    %53 = vector.load %arg1[%c0_62, %c1_63, %c3_64, %c0_65] : memref<1x3x32x32xf32, #tpu.memory_space<vmem>>, vector<1x1x28x32xf32>
    %54 = vector.shape_cast %53 : vector<1x1x28x32xf32> to vector<28x32xf32>
    %c8 = arith.constant 8 : index
    %c0_66 = arith.constant 0 : index
    %c0_67 = arith.constant 0 : index
    %55 = vector.load %arg2[%c8, %c0_66, %c0_67] : memref<15x32x256xf32, #tpu.memory_space<vmem>>, vector<1x32x256xf32>
    %56 = vector.shape_cast %55 : vector<1x32x256xf32> to vector<32x256xf32>
    %cst_68 = arith.constant dense<0.000000e+00> : vector<28x256xf32>
    %57 = tpu.matmul %54, %56, %cst_68 {dimension_numbers = #tpu.dot_dimension_numbers<[1], [0], [0], [1], [0, 0, 1, 1], [], []>} : vector<28x32xf32>, vector<32x256xf32>, vector<28x256xf32> -> vector<28x256xf32>
    %58 = arith.addf %52, %57 : vector<28x256xf32>
    %c0_69 = arith.constant 0 : index
    %c1_70 = arith.constant 1 : index
    %c4_71 = arith.constant 4 : index
    %c0_72 = arith.constant 0 : index
    %59 = vector.load %arg1[%c0_69, %c1_70, %c4_71, %c0_72] : memref<1x3x32x32xf32, #tpu.memory_space<vmem>>, vector<1x1x28x32xf32>
    %60 = vector.shape_cast %59 : vector<1x1x28x32xf32> to vector<28x32xf32>
    %c9 = arith.constant 9 : index
    %c0_73 = arith.constant 0 : index
    %c0_74 = arith.constant 0 : index
    %61 = vector.load %arg2[%c9, %c0_73, %c0_74] : memref<15x32x256xf32, #tpu.memory_space<vmem>>, vector<1x32x256xf32>
    %62 = vector.shape_cast %61 : vector<1x32x256xf32> to vector<32x256xf32>
    %cst_75 = arith.constant dense<0.000000e+00> : vector<28x256xf32>
    %63 = tpu.matmul %60, %62, %cst_75 {dimension_numbers = #tpu.dot_dimension_numbers<[1], [0], [0], [1], [0, 0, 1, 1], [], []>} : vector<28x32xf32>, vector<32x256xf32>, vector<28x256xf32> -> vector<28x256xf32>
    %64 = arith.addf %58, %63 : vector<28x256xf32>
    %c0_76 = arith.constant 0 : index
    %c2_77 = arith.constant 2 : index
    %c0_78 = arith.constant 0 : index
    %c0_79 = arith.constant 0 : index
    %65 = vector.load %arg1[%c0_76, %c2_77, %c0_78, %c0_79] : memref<1x3x32x32xf32, #tpu.memory_space<vmem>>, vector<1x1x28x32xf32>
    %66 = vector.shape_cast %65 : vector<1x1x28x32xf32> to vector<28x32xf32>
    %c10 = arith.constant 10 : index
    %c0_80 = arith.constant 0 : index
    %c0_81 = arith.constant 0 : index
    %67 = vector.load %arg2[%c10, %c0_80, %c0_81] : memref<15x32x256xf32, #tpu.memory_space<vmem>>, vector<1x32x256xf32>
    %68 = vector.shape_cast %67 : vector<1x32x256xf32> to vector<32x256xf32>
    %cst_82 = arith.constant dense<0.000000e+00> : vector<28x256xf32>
    %69 = tpu.matmul %66, %68, %cst_82 {dimension_numbers = #tpu.dot_dimension_numbers<[1], [0], [0], [1], [0, 0, 1, 1], [], []>} : vector<28x32xf32>, vector<32x256xf32>, vector<28x256xf32> -> vector<28x256xf32>
    %70 = arith.addf %64, %69 : vector<28x256xf32>
    %c0_83 = arith.constant 0 : index
    %c2_84 = arith.constant 2 : index
    %c1_85 = arith.constant 1 : index
    %c0_86 = arith.constant 0 : index
    %71 = vector.load %arg1[%c0_83, %c2_84, %c1_85, %c0_86] : memref<1x3x32x32xf32, #tpu.memory_space<vmem>>, vector<1x1x28x32xf32>
    %72 = vector.shape_cast %71 : vector<1x1x28x32xf32> to vector<28x32xf32>
    %c11 = arith.constant 11 : index
    %c0_87 = arith.constant 0 : index
    %c0_88 = arith.constant 0 : index
    %73 = vector.load %arg2[%c11, %c0_87, %c0_88] : memref<15x32x256xf32, #tpu.memory_space<vmem>>, vector<1x32x256xf32>
    %74 = vector.shape_cast %73 : vector<1x32x256xf32> to vector<32x256xf32>
    %cst_89 = arith.constant dense<0.000000e+00> : vector<28x256xf32>
    %75 = tpu.matmul %72, %74, %cst_89 {dimension_numbers = #tpu.dot_dimension_numbers<[1], [0], [0], [1], [0, 0, 1, 1], [], []>} : vector<28x32xf32>, vector<32x256xf32>, vector<28x256xf32> -> vector<28x256xf32>
    %76 = arith.addf %70, %75 : vector<28x256xf32>
    %c0_90 = arith.constant 0 : index
    %c2_91 = arith.constant 2 : index
    %c2_92 = arith.constant 2 : index
    %c0_93 = arith.constant 0 : index
    %77 = vector.load %arg1[%c0_90, %c2_91, %c2_92, %c0_93] : memref<1x3x32x32xf32, #tpu.memory_space<vmem>>, vector<1x1x28x32xf32>
    %78 = vector.shape_cast %77 : vector<1x1x28x32xf32> to vector<28x32xf32>
    %c12 = arith.constant 12 : index
    %c0_94 = arith.constant 0 : index
    %c0_95 = arith.constant 0 : index
    %79 = vector.load %arg2[%c12, %c0_94, %c0_95] : memref<15x32x256xf32, #tpu.memory_space<vmem>>, vector<1x32x256xf32>
    %80 = vector.shape_cast %79 : vector<1x32x256xf32> to vector<32x256xf32>
    %cst_96 = arith.constant dense<0.000000e+00> : vector<28x256xf32>
    %81 = tpu.matmul %78, %80, %cst_96 {dimension_numbers = #tpu.dot_dimension_numbers<[1], [0], [0], [1], [0, 0, 1, 1], [], []>} : vector<28x32xf32>, vector<32x256xf32>, vector<28x256xf32> -> vector<28x256xf32>
    %82 = arith.addf %76, %81 : vector<28x256xf32>
    %c0_97 = arith.constant 0 : index
    %c2_98 = arith.constant 2 : index
    %c3_99 = arith.constant 3 : index
    %c0_100 = arith.constant 0 : index
    %83 = vector.load %arg1[%c0_97, %c2_98, %c3_99, %c0_100] : memref<1x3x32x32xf32, #tpu.memory_space<vmem>>, vector<1x1x28x32xf32>
    %84 = vector.shape_cast %83 : vector<1x1x28x32xf32> to vector<28x32xf32>
    %c13 = arith.constant 13 : index
    %c0_101 = arith.constant 0 : index
    %c0_102 = arith.constant 0 : index
    %85 = vector.load %arg2[%c13, %c0_101, %c0_102] : memref<15x32x256xf32, #tpu.memory_space<vmem>>, vector<1x32x256xf32>
    %86 = vector.shape_cast %85 : vector<1x32x256xf32> to vector<32x256xf32>
    %cst_103 = arith.constant dense<0.000000e+00> : vector<28x256xf32>
    %87 = tpu.matmul %84, %86, %cst_103 {dimension_numbers = #tpu.dot_dimension_numbers<[1], [0], [0], [1], [0, 0, 1, 1], [], []>} : vector<28x32xf32>, vector<32x256xf32>, vector<28x256xf32> -> vector<28x256xf32>
    %88 = arith.addf %82, %87 : vector<28x256xf32>
    %c0_104 = arith.constant 0 : index
    %c2_105 = arith.constant 2 : index
    %c4_106 = arith.constant 4 : index
    %c0_107 = arith.constant 0 : index
    %89 = vector.load %arg1[%c0_104, %c2_105, %c4_106, %c0_107] : memref<1x3x32x32xf32, #tpu.memory_space<vmem>>, vector<1x1x28x32xf32>
    %90 = vector.shape_cast %89 : vector<1x1x28x32xf32> to vector<28x32xf32>
    %c14 = arith.constant 14 : index
    %c0_108 = arith.constant 0 : index
    %c0_109 = arith.constant 0 : index
    %91 = vector.load %arg2[%c14, %c0_108, %c0_109] : memref<15x32x256xf32, #tpu.memory_space<vmem>>, vector<1x32x256xf32>
    %92 = vector.shape_cast %91 : vector<1x32x256xf32> to vector<32x256xf32>
    %cst_110 = arith.constant dense<0.000000e+00> : vector<28x256xf32>
    %93 = tpu.matmul %90, %92, %cst_110 {dimension_numbers = #tpu.dot_dimension_numbers<[1], [0], [0], [1], [0, 0, 1, 1], [], []>} : vector<28x32xf32>, vector<32x256xf32>, vector<28x256xf32> -> vector<28x256xf32>
    %94 = arith.addf %88, %93 : vector<28x256xf32>
    %c0_111 = arith.constant 0 : index
    %c0_112 = arith.constant 0 : index
    %95 = vector.load %arg3[%c0_111, %c0_112] : memref<1x256xf32, #tpu.memory_space<vmem>>, vector<1x256xf32>
    %96 = vector.broadcast %95 : vector<1x256xf32> to vector<28x256xf32>
    %97 = arith.addf %94, %96 : vector<28x256xf32>
    %98 = vector.extract_strided_slice %97 {offsets = [0, 0], sizes = [28, 128], strides = [1, 1]} : vector<28x256xf32> to vector<28x128xf32>
    %99 = vector.extract_strided_slice %97 {offsets = [0, 128], sizes = [28, 128], strides = [1, 1]} : vector<28x256xf32> to vector<28x128xf32>
    %100 = arith.maximumf %98, %99 : vector<28x128xf32>
    %c0_113 = arith.constant 0 : index
    %c0_114 = arith.constant 0 : index
    %101 = vector.load %arg13[%c0_113, %c0_114] : memref<32x128xf32, #tpu.memory_space<vmem>>, vector<28x128xf32>
    tpu.vector_store %arg13[%c0_113, %c0_114], %100 {strides = array<i32>} : memref<32x128xf32, #tpu.memory_space<vmem>>, vector<28x128xf32>,
    %cst_115 = arith.constant 0.000000e+00 : f32
    %102 = vector.broadcast %cst_115 : f32 to vector<19x256xf32>
    %c0_116 = arith.constant 0 : index
    %c0_117 = arith.constant 0 : index
    %103 = vector.load %arg13[%c0_116, %c0_117] : memref<32x128xf32, #tpu.memory_space<vmem>>, vector<19x128xf32>
    %c1_118 = arith.constant 1 : index
    %c0_119 = arith.constant 0 : index
    %104 = vector.load %arg13[%c1_118, %c0_119] : memref<32x128xf32, #tpu.memory_space<vmem>>, vector<19x128xf32>
    %105 = arith.maximumf %103, %104 : vector<19x128xf32>
    %cst_120 = arith.constant 0.000000e+00 : f32
    %106 = vector.broadcast %cst_120 : f32 to vector<19x128xf32>
    %107 = arith.maximumf %105, %106 : vector<19x128xf32>
    %c0_121 = arith.constant 0 : index
    %c0_122 = arith.constant 0 : index
    %c0_123 = arith.constant 0 : index
    %108 = vector.load %arg4[%c0_121, %c0_122, %c0_123] : memref<5x128x256xf32, #tpu.memory_space<vmem>>, vector<1x128x256xf32>
    %109 = vector.shape_cast %108 : vector<1x128x256xf32> to vector<128x256xf32>
    %cst_124 = arith.constant dense<0.000000e+00> : vector<19x256xf32>
    %110 = tpu.matmul %107, %109, %cst_124 {dimension_numbers = #tpu.dot_dimension_numbers<[1], [0], [0], [1], [0, 0, 1, 1], [], []>} : vector<19x128xf32>, vector<128x256xf32>, vector<19x256xf32> -> vector<19x256xf32>
    %111 = arith.addf %102, %110 : vector<19x256xf32>
    %c2_125 = arith.constant 2 : index
    %c0_126 = arith.constant 0 : index
    %112 = vector.load %arg13[%c2_125, %c0_126] : memref<32x128xf32, #tpu.memory_space<vmem>>, vector<19x128xf32>
    %c3_127 = arith.constant 3 : index
    %c0_128 = arith.constant 0 : index
    %113 = vector.load %arg13[%c3_127, %c0_128] : memref<32x128xf32, #tpu.memory_space<vmem>>, vector<19x128xf32>
    %114 = arith.maximumf %112, %113 : vector<19x128xf32>
    %cst_129 = arith.constant 0.000000e+00 : f32
    %115 = vector.broadcast %cst_129 : f32 to vector<19x128xf32>
    %116 = arith.maximumf %114, %115 : vector<19x128xf32>
    %c1_130 = arith.constant 1 : index
    %c0_131 = arith.constant 0 : index
    %c0_132 = arith.constant 0 : index
    %117 = vector.load %arg4[%c1_130, %c0_131, %c0_132] : memref<5x128x256xf32, #tpu.memory_space<vmem>>, vector<1x128x256xf32>
    %118 = vector.shape_cast %117 : vector<1x128x256xf32> to vector<128x256xf32>
    %cst_133 = arith.constant dense<0.000000e+00> : vector<19x256xf32>
    %119 = tpu.matmul %116, %118, %cst_133 {dimension_numbers = #tpu.dot_dimension_numbers<[1], [0], [0], [1], [0, 0, 1, 1], [], []>} : vector<19x128xf32>, vector<128x256xf32>, vector<19x256xf32> -> vector<19x256xf32>
    %120 = arith.addf %111, %119 : vector<19x256xf32>
    %c4_134 = arith.constant 4 : index
    %c0_135 = arith.constant 0 : index
    %121 = vector.load %arg13[%c4_134, %c0_135] : memref<32x128xf32, #tpu.memory_space<vmem>>, vector<19x128xf32>
    %c5_136 = arith.constant 5 : index
    %c0_137 = arith.constant 0 : index
    %122 = vector.load %arg13[%c5_136, %c0_137] : memref<32x128xf32, #tpu.memory_space<vmem>>, vector<19x128xf32>
    %123 = arith.maximumf %121, %122 : vector<19x128xf32>
    %cst_138 = arith.constant 0.000000e+00 : f32
    %124 = vector.broadcast %cst_138 : f32 to vector<19x128xf32>
    %125 = arith.maximumf %123, %124 : vector<19x128xf32>
    %c2_139 = arith.constant 2 : index
    %c0_140 = arith.constant 0 : index
    %c0_141 = arith.constant 0 : index
    %126 = vector.load %arg4[%c2_139, %c0_140, %c0_141] : memref<5x128x256xf32, #tpu.memory_space<vmem>>, vector<1x128x256xf32>
    %127 = vector.shape_cast %126 : vector<1x128x256xf32> to vector<128x256xf32>
    %cst_142 = arith.constant dense<0.000000e+00> : vector<19x256xf32>
    %128 = tpu.matmul %125, %127, %cst_142 {dimension_numbers = #tpu.dot_dimension_numbers<[1], [0], [0], [1], [0, 0, 1, 1], [], []>} : vector<19x128xf32>, vector<128x256xf32>, vector<19x256xf32> -> vector<19x256xf32>
    %129 = arith.addf %120, %128 : vector<19x256xf32>
    %c6_143 = arith.constant 6 : index
    %c0_144 = arith.constant 0 : index
    %130 = vector.load %arg13[%c6_143, %c0_144] : memref<32x128xf32, #tpu.memory_space<vmem>>, vector<19x128xf32>
    %c7_145 = arith.constant 7 : index
    %c0_146 = arith.constant 0 : index
    %131 = vector.load %arg13[%c7_145, %c0_146] : memref<32x128xf32, #tpu.memory_space<vmem>>, vector<19x128xf32>
    %132 = arith.maximumf %130, %131 : vector<19x128xf32>
    %cst_147 = arith.constant 0.000000e+00 : f32
    %133 = vector.broadcast %cst_147 : f32 to vector<19x128xf32>
    %134 = arith.maximumf %132, %133 : vector<19x128xf32>
    %c3_148 = arith.constant 3 : index
    %c0_149 = arith.constant 0 : index
    %c0_150 = arith.constant 0 : index
    %135 = vector.load %arg4[%c3_148, %c0_149, %c0_150] : memref<5x128x256xf32, #tpu.memory_space<vmem>>, vector<1x128x256xf32>
    %136 = vector.shape_cast %135 : vector<1x128x256xf32> to vector<128x256xf32>
    %cst_151 = arith.constant dense<0.000000e+00> : vector<19x256xf32>
    %137 = tpu.matmul %134, %136, %cst_151 {dimension_numbers = #tpu.dot_dimension_numbers<[1], [0], [0], [1], [0, 0, 1, 1], [], []>} : vector<19x128xf32>, vector<128x256xf32>, vector<19x256xf32> -> vector<19x256xf32>
    %138 = arith.addf %129, %137 : vector<19x256xf32>
    %c8_152 = arith.constant 8 : index
    %c0_153 = arith.constant 0 : index
    %139 = vector.load %arg13[%c8_152, %c0_153] : memref<32x128xf32, #tpu.memory_space<vmem>>, vector<19x128xf32>
    %c9_154 = arith.constant 9 : index
    %c0_155 = arith.constant 0 : index
    %140 = vector.load %arg13[%c9_154, %c0_155] : memref<32x128xf32, #tpu.memory_space<vmem>>, vector<19x128xf32>
    %141 = arith.maximumf %139, %140 : vector<19x128xf32>
    %cst_156 = arith.constant 0.000000e+00 : f32
    %142 = vector.broadcast %cst_156 : f32 to vector<19x128xf32>
    %143 = arith.maximumf %141, %142 : vector<19x128xf32>
    %c4_157 = arith.constant 4 : index
    %c0_158 = arith.constant 0 : index
    %c0_159 = arith.constant 0 : index
    %144 = vector.load %arg4[%c4_157, %c0_158, %c0_159] : memref<5x128x256xf32, #tpu.memory_space<vmem>>, vector<1x128x256xf32>
    %145 = vector.shape_cast %144 : vector<1x128x256xf32> to vector<128x256xf32>
    %cst_160 = arith.constant dense<0.000000e+00> : vector<19x256xf32>
    %146 = tpu.matmul %143, %145, %cst_160 {dimension_numbers = #tpu.dot_dimension_numbers<[1], [0], [0], [1], [0, 0, 1, 1], [], []>} : vector<19x128xf32>, vector<128x256xf32>, vector<19x256xf32> -> vector<19x256xf32>
    %147 = arith.addf %138, %146 : vector<19x256xf32>
    %c0_161 = arith.constant 0 : index
    %c0_162 = arith.constant 0 : index
    %148 = vector.load %arg5[%c0_161, %c0_162] : memref<1x256xf32, #tpu.memory_space<vmem>>, vector<1x256xf32>
    %149 = vector.broadcast %148 : vector<1x256xf32> to vector<19x256xf32>
    %150 = arith.addf %147, %149 : vector<19x256xf32>
    %151 = vector.extract_strided_slice %150 {offsets = [0, 0], sizes = [19, 128], strides = [1, 1]} : vector<19x256xf32> to vector<19x128xf32>
    %152 = vector.extract_strided_slice %150 {offsets = [0, 128], sizes = [19, 128], strides = [1, 1]} : vector<19x256xf32> to vector<19x128xf32>
    %153 = arith.maximumf %151, %152 : vector<19x128xf32>
    %c0_163 = arith.constant 0 : index
    %c0_164 = arith.constant 0 : index
    %154 = vector.load %arg14[%c0_163, %c0_164] : memref<32x128xf32, #tpu.memory_space<vmem>>, vector<19x128xf32>
    tpu.vector_store %arg14[%c0_163, %c0_164], %153 {strides = array<i32>} : memref<32x128xf32, #tpu.memory_space<vmem>>, vector<19x128xf32>,
    %cst_165 = arith.constant 0.000000e+00 : f32
    %155 = vector.broadcast %cst_165 : f32 to vector<1x120xf32>
    %c0_166 = arith.constant 0 : index
    %c0_167 = arith.constant 0 : index
    %156 = vector.load %arg14[%c0_166, %c0_167] : memref<32x128xf32, #tpu.memory_space<vmem>>, vector<1x128xf32>
    %c2_168 = arith.constant 2 : index
    %c0_169 = arith.constant 0 : index
    %157 = vector.load %arg14[%c2_168, %c0_169] : memref<32x128xf32, #tpu.memory_space<vmem>>, vector<1x128xf32>
    %158 = arith.maximumf %156, %157 : vector<1x128xf32>
    %cst_170 = arith.constant 0.000000e+00 : f32
    %159 = vector.broadcast %cst_170 : f32 to vector<1x128xf32>
    %160 = arith.maximumf %158, %159 : vector<1x128xf32>
    %c0_171 = arith.constant 0 : index
    %c0_172 = arith.constant 0 : index
    %c0_173 = arith.constant 0 : index
    %161 = vector.load %arg6[%c0_171, %c0_172, %c0_173] : memref<5x128x120xf32, #tpu.memory_space<vmem>>, vector<1x128x120xf32>
    %162 = vector.shape_cast %161 : vector<1x128x120xf32> to vector<128x120xf32>
    %cst_174 = arith.constant dense<0.000000e+00> : vector<1x120xf32>
    %163 = tpu.matmul %160, %162, %cst_174 {dimension_numbers = #tpu.dot_dimension_numbers<[1], [0], [0], [1], [0, 0, 1, 1], [], []>} : vector<1x128xf32>, vector<128x120xf32>, vector<1x120xf32> -> vector<1x120xf32>
    %164 = arith.addf %155, %163 : vector<1x120xf32>
    %c4_175 = arith.constant 4 : index
    %c0_176 = arith.constant 0 : index
    %165 = vector.load %arg14[%c4_175, %c0_176] : memref<32x128xf32, #tpu.memory_space<vmem>>, vector<1x128xf32>
    %c6_177 = arith.constant 6 : index
    %c0_178 = arith.constant 0 : index
    %166 = vector.load %arg14[%c6_177, %c0_178] : memref<32x128xf32, #tpu.memory_space<vmem>>, vector<1x128xf32>
    %167 = arith.maximumf %165, %166 : vector<1x128xf32>
    %cst_179 = arith.constant 0.000000e+00 : f32
    %168 = vector.broadcast %cst_179 : f32 to vector<1x128xf32>
    %169 = arith.maximumf %167, %168 : vector<1x128xf32>
    %c1_180 = arith.constant 1 : index
    %c0_181 = arith.constant 0 : index
    %c0_182 = arith.constant 0 : index
    %170 = vector.load %arg6[%c1_180, %c0_181, %c0_182] : memref<5x128x120xf32, #tpu.memory_space<vmem>>, vector<1x128x120xf32>
    %171 = vector.shape_cast %170 : vector<1x128x120xf32> to vector<128x120xf32>
    %cst_183 = arith.constant dense<0.000000e+00> : vector<1x120xf32>
    %172 = tpu.matmul %169, %171, %cst_183 {dimension_numbers = #tpu.dot_dimension_numbers<[1], [0], [0], [1], [0, 0, 1, 1], [], []>} : vector<1x128xf32>, vector<128x120xf32>, vector<1x120xf32> -> vector<1x120xf32>
    %173 = arith.addf %164, %172 : vector<1x120xf32>
    %c8_184 = arith.constant 8 : index
    %c0_185 = arith.constant 0 : index
    %174 = vector.load %arg14[%c8_184, %c0_185] : memref<32x128xf32, #tpu.memory_space<vmem>>, vector<1x128xf32>
    %c10_186 = arith.constant 10 : index
    %c0_187 = arith.constant 0 : index
    %175 = vector.load %arg14[%c10_186, %c0_187] : memref<32x128xf32, #tpu.memory_space<vmem>>, vector<1x128xf32>
    %176 = arith.maximumf %174, %175 : vector<1x128xf32>
    %cst_188 = arith.constant 0.000000e+00 : f32
    %177 = vector.broadcast %cst_188 : f32 to vector<1x128xf32>
    %178 = arith.maximumf %176, %177 : vector<1x128xf32>
    %c2_189 = arith.constant 2 : index
    %c0_190 = arith.constant 0 : index
    %c0_191 = arith.constant 0 : index
    %179 = vector.load %arg6[%c2_189, %c0_190, %c0_191] : memref<5x128x120xf32, #tpu.memory_space<vmem>>, vector<1x128x120xf32>
    %180 = vector.shape_cast %179 : vector<1x128x120xf32> to vector<128x120xf32>
    %cst_192 = arith.constant dense<0.000000e+00> : vector<1x120xf32>
    %181 = tpu.matmul %178, %180, %cst_192 {dimension_numbers = #tpu.dot_dimension_numbers<[1], [0], [0], [1], [0, 0, 1, 1], [], []>} : vector<1x128xf32>, vector<128x120xf32>, vector<1x120xf32> -> vector<1x120xf32>
    %182 = arith.addf %173, %181 : vector<1x120xf32>
    %c12_193 = arith.constant 12 : index
    %c0_194 = arith.constant 0 : index
    %183 = vector.load %arg14[%c12_193, %c0_194] : memref<32x128xf32, #tpu.memory_space<vmem>>, vector<1x128xf32>
    %c14_195 = arith.constant 14 : index
    %c0_196 = arith.constant 0 : index
    %184 = vector.load %arg14[%c14_195, %c0_196] : memref<32x128xf32, #tpu.memory_space<vmem>>, vector<1x128xf32>
    %185 = arith.maximumf %183, %184 : vector<1x128xf32>
    %cst_197 = arith.constant 0.000000e+00 : f32
    %186 = vector.broadcast %cst_197 : f32 to vector<1x128xf32>
    %187 = arith.maximumf %185, %186 : vector<1x128xf32>
    %c3_198 = arith.constant 3 : index
    %c0_199 = arith.constant 0 : index
    %c0_200 = arith.constant 0 : index
    %188 = vector.load %arg6[%c3_198, %c0_199, %c0_200] : memref<5x128x120xf32, #tpu.memory_space<vmem>>, vector<1x128x120xf32>
    %189 = vector.shape_cast %188 : vector<1x128x120xf32> to vector<128x120xf32>
    %cst_201 = arith.constant dense<0.000000e+00> : vector<1x120xf32>
    %190 = tpu.matmul %187, %189, %cst_201 {dimension_numbers = #tpu.dot_dimension_numbers<[1], [0], [0], [1], [0, 0, 1, 1], [], []>} : vector<1x128xf32>, vector<128x120xf32>, vector<1x120xf32> -> vector<1x120xf32>
    %191 = arith.addf %182, %190 : vector<1x120xf32>
    %c16 = arith.constant 16 : index
    %c0_202 = arith.constant 0 : index
    %192 = vector.load %arg14[%c16, %c0_202] : memref<32x128xf32, #tpu.memory_space<vmem>>, vector<1x128xf32>
    %c18 = arith.constant 18 : index
    %c0_203 = arith.constant 0 : index
    %193 = vector.load %arg14[%c18, %c0_203] : memref<32x128xf32, #tpu.memory_space<vmem>>, vector<1x128xf32>
    %194 = arith.maximumf %192, %193 : vector<1x128xf32>
    %cst_204 = arith.constant 0.000000e+00 : f32
    %195 = vector.broadcast %cst_204 : f32 to vector<1x128xf32>
    %196 = arith.maximumf %194, %195 : vector<1x128xf32>
    %c4_205 = arith.constant 4 : index
    %c0_206 = arith.constant 0 : index
    %c0_207 = arith.constant 0 : index
    %197 = vector.load %arg6[%c4_205, %c0_206, %c0_207] : memref<5x128x120xf32, #tpu.memory_space<vmem>>, vector<1x128x120xf32>
    %198 = vector.shape_cast %197 : vector<1x128x120xf32> to vector<128x120xf32>
    %cst_208 = arith.constant dense<0.000000e+00> : vector<1x120xf32>
    %199 = tpu.matmul %196, %198, %cst_208 {dimension_numbers = #tpu.dot_dimension_numbers<[1], [0], [0], [1], [0, 0, 1, 1], [], []>} : vector<1x128xf32>, vector<128x120xf32>, vector<1x120xf32> -> vector<1x120xf32>
    %200 = arith.addf %191, %199 : vector<1x120xf32>
    %c0_209 = arith.constant 0 : index
    %c0_210 = arith.constant 0 : index
    %201 = vector.load %arg7[%c0_209, %c0_210] : memref<1x120xf32, #tpu.memory_space<vmem>>, vector<1x120xf32>
    %202 = arith.addf %200, %201 : vector<1x120xf32>
    %cst_211 = arith.constant 0.000000e+00 : f32
    %203 = vector.broadcast %cst_211 : f32 to vector<1x120xf32>
    %204 = arith.maximumf %202, %203 : vector<1x120xf32>
    %c0_212 = arith.constant 0 : index
    %c0_213 = arith.constant 0 : index
    %205 = vector.load %arg8[%c0_212, %c0_213] : memref<120x84xf32, #tpu.memory_space<vmem>>, vector<120x84xf32>
    %cst_214 = arith.constant dense<0.000000e+00> : vector<1x84xf32>
    %206 = tpu.matmul %204, %205, %cst_214 {dimension_numbers = #tpu.dot_dimension_numbers<[1], [0], [0], [1], [0, 0, 1, 1], [], []>} : vector<1x120xf32>, vector<120x84xf32>, vector<1x84xf32> -> vector<1x84xf32>
    %c0_215 = arith.constant 0 : index
    %c0_216 = arith.constant 0 : index
    %207 = vector.load %arg9[%c0_215, %c0_216] : memref<1x84xf32, #tpu.memory_space<vmem>>, vector<1x84xf32>
    %208 = arith.addf %206, %207 : vector<1x84xf32>
    %cst_217 = arith.constant 0.000000e+00 : f32
    %209 = vector.broadcast %cst_217 : f32 to vector<1x84xf32>
    %210 = arith.maximumf %208, %209 : vector<1x84xf32>
    %c0_218 = arith.constant 0 : index
    %c0_219 = arith.constant 0 : index
    %211 = vector.load %arg10[%c0_218, %c0_219] : memref<84x10xf32, #tpu.memory_space<vmem>>, vector<84x10xf32>
    %cst_220 = arith.constant dense<0.000000e+00> : vector<1x10xf32>
    %212 = tpu.matmul %210, %211, %cst_220 {dimension_numbers = #tpu.dot_dimension_numbers<[1], [0], [0], [1], [0, 0, 1, 1], [], []>} : vector<1x84xf32>, vector<84x10xf32>, vector<1x10xf32> -> vector<1x10xf32>
    %c0_221 = arith.constant 0 : index
    %c0_222 = arith.constant 0 : index
    %213 = vector.load %arg11[%c0_221, %c0_222] : memref<1x10xf32, #tpu.memory_space<vmem>>, vector<1x10xf32>
    %214 = arith.addf %212, %213 : vector<1x10xf32>
    %c0_223 = arith.constant 0 : index
    %c0_224 = arith.constant 0 : index
    %c0_225 = arith.constant 0 : index
    %215 = vector.load %arg12[%c0_223, %c0_224, %c0_225] : memref<1x1x10xf32, #tpu.memory_space<vmem>>, vector<1x1x10xf32>
    %216 = vector.shape_cast %215 : vector<1x1x10xf32> to vector<1x10xf32>
    %217 = vector.shape_cast %214 : vector<1x10xf32> to vector<1x1x10xf32>
    tpu.vector_store %arg12[%c0_223, %c0_224, %c0_225], %217 {strides = array<i32>} : memref<1x1x10xf32, #tpu.memory_space<vmem>>, vector<1x1x10xf32>,
    return
  }
  func.func @transform_0(%arg0: i32) -> (i32, i32, i32, i32) {
    %c0_i32 = arith.constant 0 : i32
    %c0_i32_0 = arith.constant 0 : i32
    %c0_i32_1 = arith.constant 0 : i32
    %c0_i32_2 = arith.constant 0 : i32
    return %arg0, %c0_i32, %c0_i32_0, %c0_i32_1 : i32, i32, i32, i32
  }
  func.func @transform_1(%arg0: i32) -> (i32, i32, i32) {
    %c0_i32 = arith.constant 0 : i32
    %c0_i32_0 = arith.constant 0 : i32
    %c0_i32_1 = arith.constant 0 : i32
    %c0_i32_2 = arith.constant 0 : i32
    return %c0_i32, %c0_i32_0, %c0_i32_1 : i32, i32, i32
  }
  func.func @transform_2(%arg0: i32) -> (i32, i32) {
    %c0_i32 = arith.constant 0 : i32
    %c0_i32_0 = arith.constant 0 : i32
    %c0_i32_1 = arith.constant 0 : i32
    return %c0_i32, %c0_i32_0 : i32, i32
  }
  func.func @transform_3(%arg0: i32) -> (i32, i32, i32) {
    %c0_i32 = arith.constant 0 : i32
    %c0_i32_0 = arith.constant 0 : i32
    %c0_i32_1 = arith.constant 0 : i32
    %c0_i32_2 = arith.constant 0 : i32
    return %c0_i32, %c0_i32_0, %c0_i32_1 : i32, i32, i32
  }
  func.func @transform_4(%arg0: i32) -> (i32, i32) {
    %c0_i32 = arith.constant 0 : i32
    %c0_i32_0 = arith.constant 0 : i32
    %c0_i32_1 = arith.constant 0 : i32
    return %c0_i32, %c0_i32_0 : i32, i32
  }
  func.func @transform_5(%arg0: i32) -> (i32, i32, i32) {
    %c0_i32 = arith.constant 0 : i32
    %c0_i32_0 = arith.constant 0 : i32
    %c0_i32_1 = arith.constant 0 : i32
    %c0_i32_2 = arith.constant 0 : i32
    return %c0_i32, %c0_i32_0, %c0_i32_1 : i32, i32, i32
  }
  func.func @transform_6(%arg0: i32) -> (i32, i32) {
    %c0_i32 = arith.constant 0 : i32
    %c0_i32_0 = arith.constant 0 : i32
    %c0_i32_1 = arith.constant 0 : i32
    return %c0_i32, %c0_i32_0 : i32, i32
  }
  func.func @transform_7(%arg0: i32) -> (i32, i32) {
    %c0_i32 = arith.constant 0 : i32
    %c0_i32_0 = arith.constant 0 : i32
    %c0_i32_1 = arith.constant 0 : i32
    return %c0_i32, %c0_i32_0 : i32, i32
  }
  func.func @transform_8(%arg0: i32) -> (i32, i32) {
    %c0_i32 = arith.constant 0 : i32
    %c0_i32_0 = arith.constant 0 : i32
    %c0_i32_1 = arith.constant 0 : i32
    return %c0_i32, %c0_i32_0 : i32, i32
  }
  func.func @transform_9(%arg0: i32) -> (i32, i32) {
    %c0_i32 = arith.constant 0 : i32
    %c0_i32_0 = arith.constant 0 : i32
    %c0_i32_1 = arith.constant 0 : i32
    return %c0_i32, %c0_i32_0 : i32, i32
  }
  func.func @transform_10(%arg0: i32) -> (i32, i32) {
    %c0_i32 = arith.constant 0 : i32
    %c0_i32_0 = arith.constant 0 : i32
    %c0_i32_1 = arith.constant 0 : i32
    return %c0_i32, %c0_i32_0 : i32, i32
  }
  func.func @transform_11(%arg0: i32) -> (i32, i32, i32) {
    %c0_i32 = arith.constant 0 : i32
    %c0_i32_0 = arith.constant 0 : i32
    %c0_i32_1 = arith.constant 0 : i32
    return %arg0, %c0_i32, %c0_i32_0 : i32, i32, i32
  }
}

</mosaic_0001>

<bundles_post_ra>
// kernel: lenet5_forward.1
= control target key start
LH: loop header
LB: loop body
LE: loop exit
PB: predicated region body
PF: predicated region fallthrough
CT: control target
= control target key end

     0   :  { %16 = vsyncpa [#allocation5], 0  ;;  %s6347_s0 = inlined_call_operand.vmem [shape: f32[2,3,32,32], index: 0, kind: input, shape index: {}]   ;;  %s6348_s1 = inlined_call_operand.hbm [shape: f32[15,32,256], index: 1, kind: input, shape index: {}]   ;;  %s6349_s2 = inlined_call_operand.vmem [shape: f32[1,256], index: 2, kind: input, shape index: {}]   ;;  %s6350_s3 = inlined_call_operand.vmem [shape: f32[5,128,256], index: 3, kind: input, shape index: {}]   ;;  %s6351_s4 = inlined_call_operand.vmem [shape: f32[1,256], index: 4, kind: input, shape index: {}]   ;;  %s6352_s5 = inlined_call_operand.vmem [shape: f32[5,128,120], index: 5, kind: input, shape index: {}]   ;;  %s6353_s6 = inlined_call_operand.vmem [shape: f32[1,120], index: 6, kind: input, shape index: {}]   ;;  %s6354_s7 = inlined_call_operand.vmem [shape: f32[120,84], index: 7, kind: input, shape index: {}]   ;;  %s6355_s8 = inlined_call_operand.vmem [shape: f32[1,84], index: 8, kind: input, shape index: {}]   ;;  %s6356_s9 = inlined_call_operand.vmem [shape: f32[84,10], index: 9, kind: input, shape index: {}]   ;;  %s6357_s10 = inlined_call_operand.vmem [shape: f32[1,10], index: 10, kind: input, shape index: {}]   ;;  %s6358_s11 = inlined_call_operand.hbm [shape: f32[2,1,10], index: 11, kind: output, shape index: {}]  }
   0x1   :  { %17 = vsyncpa [#allocation6], 0 }
   0x2   :  { %19 = vsyncpa [#allocation6 + $0x1], 0  ;;  %s5099_s17 = smov 0   ;;  %s5101_s18 = smov 0  }
   0x3   :  { %s5103_s19 = smov 0   ;;  %s5105_s20 = smov 0  }
   0x4 LB: > { %s5120_s21 = sadd.s32 4294967295, %s5030_s20   ;;  %s3655_s22 = sadd.s32 4294967294, %s5030_s20   ;;  %s5030_s20 = sphi %s5105_s20, %s6376_s20   ;;  %s5026_s19 = sphi %s5103_s19, %s6375_s19   ;;  %s5022_s18 = sphi %s5101_s18, %s6374_s18   ;;  %s5018_s17 = sphi %s5099_s17, %s6373_s17  }
   0x5   : > { %s5124_s23 = sadd.s32 1, %s5030_s20   ;;  %s268_s24 = sadd.s32 1, %s5026_s19 }
   0x6   : > { %s265_s25 = ssub.s32 %s5030_s20, %s5124_s23  ;;  %p278_p0 = scmp.ne.s32.totalorder %s5026_s19, %s5022_s18 }
   0x7   : > { %p266_p1 = scmp.eq.s32.totalorder %s265_s25, 0  ;;  %p279_p2 = scmp.eq.s32.totalorder %s5120_s21, 1 }
   0x8   : > { %p284_p3 = scmp.ne.s32.totalorder %s5022_s18, %s5018_s17  ;;  %p285_p4 = scmp.eq.s32.totalorder %s3655_s22, 1 }
   0x9   : > { %s5135_s26 = scalar_select %p266_p1, %s5026_s19, %s268_s24  }
   0xa   : > { %p5137_p5 = por %p279_p2, %p278_p0  ;;  %p5141_p6 = por %p285_p4, %p284_p3 }
   0xb   : > { %6362 = sst [smem:[#allocation10_spill]] %s5135_s26  ;;  %p3656_p7 = scmp.ge.s32.totalorder %s5030_s20, 1 }
   0xc   : > { %s6363_s27 = scalar_select %p5137_p5, 1, 0 }
   0xd   : > { %s6364_s28 = scalar_select %p5141_p6, 1, 0 }
   0xe   : > { %p292_p8 = scmp.lt.s32.totalorder %s5030_s20, 3  ;;  %p6359_p9 = scmp.eq.s32.totalorder %s5120_s21, 0 }
   0xf   : > { %s5032_s30 = smov [#allocation4]   ;;  %s4936_s16 = scalar_lea.hbm %s6348_s1, 15360 }
  0x10   : > { %p5148_p10 = pnand %p3656_p7, %p292_p8  ;;  %s304_s12 = sshll.u32 %s5032_s30, 4  ;;  %s305_s12 = int_to_ptr.vmem [resolvable:$true] %s304_s12 }
  0x11   : > { %p4937_p13 = scmp.ne.s32.totalorder %s6348_s1, %s4936_s16  ;;  %p4943_p3 = scmp.lt.u32.totalorder %s4936_s16, %s6348_s1 }
  0x12   : > { %s6365_s29 = scalar_select %p5148_p10, 1, 0 }
  0x13   : > { %p4885_p11 = pneg %p5148_p10 }
  0x15   : > { %p5156_p12 = pnand %p6359_p9, %p4885_p11 }
  0x17   : > { %p4938_p0 = pneg %p5156_p12 }
  0x19   : > { %p4939_p1 = pnand %p4938_p0, %p4937_p13 }
  0x1b   : > { %p4940_p2 = pneg %p4939_p1 }
  0x1d   : > { %p4945_p4 = pnand %p4943_p3, %p4940_p2 }
  0x1f   : > { %4948 = shalt.err (!%p4945_p4)
}
  0x20   : > { %s4949_s26 = scalar_lea.vmem %s305_s12, 15360  ;;  %p4957_p9 = scmp.lt.s32.totalorder %s305_s12, %s305_s12 }
  0x21   : > { %p4950_p7 = scmp.ne.s32.totalorder %s305_s12, %s4949_s26  ;;  %p4958_p6 = scmp.lt.s32.totalorder %s4949_s26, %s4949_s26 }
  0x23   : > { %p4952_p8 = pnand %p4950_p7, %p4938_p0  ;;  %p4959_p5 = por %p4958_p6, %p4957_p9 }
  0x25   : > { %p4953_p11 = pneg %p4952_p8 }
  0x27   : > { %p4960_p10 = pnand %p4959_p5, %p4953_p11 }
  0x29   : > { %4963 = shalt.err (!%p4960_p10)
}
  0x2a   : > { %s5033_s14 = smov 256   ;;  %s5034_s15 = smov 16  }
  0x2b   : > { %4888 = dma.hbm_to_vmem [thread:$0]  (!%p5156_p12), %s6348_s1, 15360, %s305_s12, [#allocation5], %s5033_s14, %s5033_s14, %s5034_s15  }
  0x2c   : > { %p6367_p13 = scmp.ne.s32.totalorder %s6365_s29, 0 }
  0x2d   : > { %p6368_p1 = scmp.eq.s32.totalorder (!%p6367_p13), %s5120_s21, 0 }
  0x2e   : > { %355 = sbr.rel (%p6367_p13) target bundleno = 1638 (0x666), region = 64 }
  0x35   : > { %5009 = dma.done.wait (%p6368_p1), [#allocation5], 15360   ;;  %p6369_p0 = pmov %p6368_p1 }
  0x36   : > { %p394_p5 = scmp.lt.s32.totalorder %s5120_s21, 1  ;;  %v5035_v0 = vmov 0.0   ;;  %v425_v1 = vld [vmem:[#allocation4 + $0x48] sm:$0xff]  ;;  %v427_v2 = vld [vmem:[#allocation4 + $0x58] sm:$0xff]  ;;  %v424_v3 = vld [vmem:[#allocation4 + $0x40] sm:$0xff]  ;;  %vm432_vm0 = vcmask 261120  }
  0x37   : > { %5011 = vsyncadd (%p6369_p0), [#allocation5], 4294951936  ;;  %406 = vst [vmem:[#allocation3 + $0x18] sm:$0xff] %v5035_v0  ;;  %509 = vmatprep.mubr.f32.mxu0 %v5035_v0  ;;  %2404 = vmatprep.mubr.f32.mxu1 %v5035_v0  ;;  %v4306_v4 = vpack.c.bf16 %v427_v2, %v425_v1  ;;  %v426_v5 = vld [vmem:[#allocation4 + $0x50] sm:$0xff]  ;;  %v429_v6 = vld [vmem:[#allocation4 + $0x68] sm:$0xff]  ;;  %vm5037_vm1 = vmmov 0  }
  0x38   : > { %402 = vst [vmem:[#allocation2 + $0x18] sm:$0xff] %v5035_v0  ;;  %405 = vst [vmem:[#allocation3 + $0x10] sm:$0xff] %v5035_v0  ;;  %s395_s26 = scalar_select %p394_p5, %s5120_s21, 1  ;;  %v431_v7 = vld [vmem:[#allocation4 + $0x78] sm:$0xff]  ;;  %v4308_v8 = vpack.c.bf16 %v426_v5, %v424_v3  ;;  %v428_v10 = vld [vmem:[#allocation4 + $0x60] sm:$0xff]  ;;  %vm3408_vm2 = vcmask 982016  }
  0x39   : > { %v4310_v9 = vpack.c.bf16 %v431_v7, %v429_v6  ;;  %v430_v11 = vld [vmem:[#allocation4 + $0x70] sm:$0xff]  ;;  %4307 = vmatprep.subr.bf16.mxu0 %v4306_v4  ;;  %v412_v12 = vld [vmem:[#allocation4 + $0x8] sm:$0xff]  ;;  %v414_v13 = vld [vmem:[#allocation4 + $0x18] sm:$0xff]  ;;  %vm3499_vm3 = vcmask 1043456   ;;  %vm3495_vm4 = vcmask 687104   ;;  %s392_s15 = sand.u32 1, %s5022_s18  }
  0x3a   : > { %s4878_s29 = smul.u32 96, %s395_s26  ;;  %4309 = vmatpush1.bf16.msra.mxu0 %v4308_v8  ;;  %v4312_v14 = vpack.c.bf16 %v430_v11, %v428_v10  ;;  %v4314_v15 = vpack.c.bf16 %v414_v13, %v412_v12  ;;  %v411_v16 = vld [vmem:[#allocation4] sm:$0xff]  ;;  %v413_v17 = vld [vmem:[#allocation4 + $0x10] sm:$0xff]  ;;  %v416_v18 = vld [vmem:[#allocation4 + $0x28] sm:$0xff]  ;;  %s3957_s26 = sshll.u32 %s5120_s21, 4  ;;  %vm3573_vm5 = vcmask 73728  }
  0x3b   : > { %4311 = vmatprep.subr.bf16.mxu0 %v4310_v9  ;;  %v418_v19 = vld [vmem:[#allocation4 + $0x38] sm:$0xff]  ;;  %v4316_v21 = vpack.c.bf16 %v413_v17, %v411_v16  ;;  %v415_v23 = vld [vmem:[#allocation4 + $0x20] sm:$0xff]  ;;  %v417_v24 = vld [vmem:[#allocation4 + $0x30] sm:$0xff]  ;;  %s6305_s30 = scalar_lea.hbm %s6358_s11, %s3957_s26  ;;  %p6370_p9 = scmp.ne.s32.totalorder %s6363_s27, 0 }
  0x3c   : > { %s5192_s16 = scalar_lea.vmem %s6347_s0, %s4878_s29  ;;  %v4318_v22 = vpack.c.bf16 %v418_v19, %v416_v18  ;;  %v641_v25 = vld [vmem:[#allocation4 + $0x88] sm:$0xff]  ;;  %v643_v26 = vld [vmem:[#allocation4 + $0x98] sm:$0xff]  ;;  %v4320_v28 = vpack.c.bf16 %v417_v24, %v415_v23  ;;  %v640_v32 = vld [vmem:[#allocation4 + $0x80] sm:$0xff]  ;;  %s393_s29 = scalar_lea.vmem [#allocation7], %s392_s15 }
  0x3d   : > { %v419_v20 = vld [vmem:[%s5192_s16 + $0x1] sm:$0xff]  ;;  %v420_v27 = vld [vmem:[%s5192_s16 + $0x9] sm:$0xff]  ;;  %v4322_v29 = vpack.c.bf16 %v643_v26, %v641_v25  ;;  %v421_v30 = vld [vmem:[%s5192_s16 + $0x11] sm:$0xff]  ;;  %s3588_s12 = sshll.u32 %s393_s29, 4  ;;  %s5038_s21 = smov [#allocation7]   ;;  %s6307_s12 = int_to_ptr.vmem [resolvable:$true] %s3588_s12 }
  0x3e   : > { %4313 = vmatpush1.bf16.msra.mxu0 %v4312_v14  ;;  %v422_v31 = vld [vmem:[%s5192_s16 + $0x19] sm:$0xf]  ;;  %v642_v33 = vld [vmem:[#allocation4 + $0x90] sm:$0xff]  ;;  %v645_v34 = vld [vmem:[#allocation4 + $0xa8] sm:$0xff]  ;;  %s4964_s14 = scalar_lea.vmem %s6307_s12, 16  ;;  %s4968_s22 = sshll.u32 %s5038_s21, 4  ;;  %s4969_s22 = int_to_ptr.vmem [resolvable:$false] %s4968_s22 }
  0x3f   : > { %4315 = vmatprep.subr.bf16.mxu0 %v4314_v15  ;;  %v647_v35 = vld [vmem:[#allocation4 + $0xb8] sm:$0xff]  ;;  %v407_v36 = vld [vmem:[%s5192_s16] sm:$0xff]  ;;  %v4324_v37 = vpack.c.bf16 %v642_v33, %v640_v32  ;;  %v646_v40 = vld [vmem:[#allocation4 + $0xb0] sm:$0xff]  ;;  %p4965_p6 = scmp.ne.s32.totalorder %s6307_s12, %s4964_s14  ;;  %s4970_s24 = scalar_lea.vmem %s4969_s22, 32 }
  0x40   : > { %v4326_v38 = vpack.c.bf16 %v647_v35, %v645_v34  ;;  %v644_v39 = vld [vmem:[#allocation4 + $0xa0] sm:$0xff]  ;;  %v763_v41 = vld [vmem:[#allocation4 + $0xc8] sm:$0xff]  ;;  %v765_v42 = vld [vmem:[#allocation4 + $0xd8] sm:$0xff]  ;;  %p4971_p2 = scmp.lt.s32.totalorder %s6307_s12, %s4969_s22  ;;  %p4972_p3 = scmp.lt.s32.totalorder %s4970_s24, %s4964_s14 }
  0x41   : > { %3662 = vmatmul.mubr.msk.f32.vlgmr.msra.gmra.mrb[0].mxu0 %vm432_vm0, %v419_v20  ;;  %v408_v43 = vld [vmem:[%s5192_s16 + $0x8] sm:$0xff]  ;;  %v4328_v44 = vpack.c.bf16 %v646_v40, %v644_v39  ;;  %v4330_v45 = vpack.c.bf16 %v765_v42, %v763_v41  ;;  %v409_v46 = vld [vmem:[%s5192_s16 + $0x10] sm:$0xff]  ;;  %v410_v47 = vld [vmem:[%s5192_s16 + $0x18] sm:$0xf]  ;;  %p4966_p10 = pnand %p4965_p6, %p6370_p9 }
  0x42   : > { %4317 = vmatpush1.bf16.msra.mxu0 %v4316_v21  ;;  %515 = vmatprep.mubr.f32.mxu0 %v5035_v0  ;;  %v762_v48 = vld [vmem:[#allocation4 + $0xc0] sm:$0xff]  ;;  %v764_v49 = vld [vmem:[#allocation4 + $0xd0] sm:$0xff]  ;;  %v767_v50 = vld [vmem:[#allocation4 + $0xe8] sm:$0xff]  ;;  %p4973_p4 = por %p4972_p3, %p4971_p2 }
  0x43   : > { %4319 = vmatprep.subr.bf16.mxu0 %v4318_v22  ;;  %v769_v51 = vld [vmem:[#allocation4 + $0xf8] sm:$0xff]  ;;  %v635_v52 = vld [vmem:[%s5192_s16 + $0x2] sm:$0xff]  ;;  %v4332_v53 = vpack.c.bf16 %v764_v49, %v762_v48  ;;  %v768_v56 = vld [vmem:[#allocation4 + $0xf0] sm:$0xff]  ;;  %p4967_p12 = pneg %p4966_p10 }
  0x44   : > { %v4334_v54 = vpack.c.bf16 %v769_v51, %v767_v50  ;;  %v766_v55 = vld [vmem:[#allocation4 + $0xe0] sm:$0xff]  ;;  %v885_v57 = vld [vmem:[#allocation4 + $0x108] sm:$0xff]  ;;  %v887_v58 = vld [vmem:[#allocation4 + $0x118] sm:$0xff] }
  0x45   : > { %3663 = vmatmul.mubr.msk.f32.gmra.mrb[2].mxu0 %vm432_vm0, %v420_v27  ;;  %v636_v59 = vld [vmem:[%s5192_s16 + $0xa] sm:$0xff]  ;;  %v4336_v60 = vpack.c.bf16 %v768_v56, %v766_v55  ;;  %v4338_v61 = vpack.c.bf16 %v887_v58, %v885_v57  ;;  %v637_v62 = vld [vmem:[%s5192_s16 + $0x12] sm:$0xff]  ;;  %v638_v63 = vld [vmem:[%s5192_s16 + $0x1a] sm:$0xf]  ;;  %p4974_p7 = pnand %p4973_p4, %p4967_p12 }
  0x46   : > { %521 = vmatprep.mubr.f32.mxu0 %v5035_v0  ;;  %4321 = vmatpush1.bf16.msra.mxu0 %v4320_v28  ;;  %v884_v1 = vld [vmem:[#allocation4 + $0x100] sm:$0xff]  ;;  %v886_v2 = vld [vmem:[#allocation4 + $0x110] sm:$0xff]  ;;  %v889_v3 = vld [vmem:[#allocation4 + $0x128] sm:$0xff] }
  0x47   : > { %4323 = vmatprep.subr.bf16.mxu0 %v4322_v29  ;;  %v891_v4 = vld [vmem:[#allocation4 + $0x138] sm:$0xff]  ;;  %v757_v5 = vld [vmem:[%s5192_s16 + $0x3] sm:$0xff]  ;;  %v4340_v6 = vpack.c.bf16 %v886_v2, %v884_v1  ;;  %v890_v9 = vld [vmem:[#allocation4 + $0x130] sm:$0xff] }
  0x48   : > { %v4342_v7 = vpack.c.bf16 %v891_v4, %v889_v3  ;;  %v888_v8 = vld [vmem:[#allocation4 + $0x120] sm:$0xff]  ;;  %v1008_v10 = vld [vmem:[#allocation4 + $0x148] sm:$0xff]  ;;  %v1010_v11 = vld [vmem:[#allocation4 + $0x158] sm:$0xff] }
  0x49   : > { %3664 = vmatmul.mubr.msk.f32.gmra.mrb[4].mxu0 %vm432_vm0, %v421_v30  ;;  %v758_v12 = vld [vmem:[%s5192_s16 + $0xb] sm:$0xff]  ;;  %v4344_v13 = vpack.c.bf16 %v890_v9, %v888_v8  ;;  %v4346_v14 = vpack.c.bf16 %v1010_v11, %v1008_v10  ;;  %v759_v15 = vld [vmem:[%s5192_s16 + $0x13] sm:$0xff]  ;;  %v760_v16 = vld [vmem:[%s5192_s16 + $0x1b] sm:$0xf] }
  0x4a   : > { %527 = vmatprep.mubr.f32.mxu0 %v5035_v0  ;;  %v1007_v17 = vld [vmem:[#allocation4 + $0x140] sm:$0xff]  ;;  %v1009_v18 = vld [vmem:[#allocation4 + $0x150] sm:$0xff]  ;;  %v1012_v19 = vld [vmem:[#allocation4 + $0x168] sm:$0xff] }
  0x4b   : > { %v1014_v20 = vld [vmem:[#allocation4 + $0x178] sm:$0xff]  ;;  %v879_v21 = vld [vmem:[%s5192_s16 + $0x4] sm:$0xff]  ;;  %v4348_v22 = vpack.c.bf16 %v1009_v18, %v1007_v17  ;;  %v1013_v25 = vld [vmem:[#allocation4 + $0x170] sm:$0xff] }
  0x4c   : > { %v4350_v23 = vpack.c.bf16 %v1014_v20, %v1012_v19  ;;  %v1011_v24 = vld [vmem:[#allocation4 + $0x160] sm:$0xff]  ;;  %v1130_v26 = vld [vmem:[#allocation4 + $0x188] sm:$0xff]  ;;  %v1132_v27 = vld [vmem:[#allocation4 + $0x198] sm:$0xff] }
  0x4d   : > { %3665 = vmatmul.mubr.msk.f32.gmra.mrb[6].mxu0 %vm432_vm0, %v422_v31  ;;  %v880_v28 = vld [vmem:[%s5192_s16 + $0xc] sm:$0xff]  ;;  %v4352_v29 = vpack.c.bf16 %v1013_v25, %v1011_v24  ;;  %v4354_v30 = vpack.c.bf16 %v1132_v27, %v1130_v26  ;;  %v881_v31 = vld [vmem:[%s5192_s16 + $0x14] sm:$0xff]  ;;  %v882_v32 = vld [vmem:[%s5192_s16 + $0x1c] sm:$0xf] }
  0x4e   : > { %610 = vmatprep.mubr.f32.mxu0 %v5035_v0  ;;  %v1129_v33 = vld [vmem:[#allocation4 + $0x180] sm:$0xff]  ;;  %v1131_v34 = vld [vmem:[#allocation4 + $0x190] sm:$0xff]  ;;  %v1134_v35 = vld [vmem:[#allocation4 + $0x1a8] sm:$0xff] }
  0x4f   : > { %v1133_v40 = vld [vmem:[#allocation4 + $0x1a0] sm:$0xff]  ;;  %v1135_v41 = vld [vmem:[#allocation4 + $0x1b0] sm:$0xff]  ;;  %v1252_v42 = vld [vmem:[#allocation4 + $0x1c8] sm:$0xff] }
  0x50   : > { %v3685_v48 = vld [vmem:[%s5192_s16 + $0x38] sm:$0xf]  ;;  %v1251_v49 = vld [vmem:[#allocation4 + $0x1c0] sm:$0xff]  ;;  %v1253_v50 = vld [vmem:[#allocation4 + $0x1d0] sm:$0xff] }
  0x51   : > { %3666 = vmatmul.mubr.msk.f32.vlgmr.msra.gmra.mrb[0].mxu0 %vm432_vm0, %v407_v36  ;;  %v1136_v36 = vld [vmem:[#allocation4 + $0x1b8] sm:$0xff]  ;;  %v1256_v51 = vld [vmem:[#allocation4 + $0x1e8] sm:$0xff]  ;;  %v1255_v56 = vld [vmem:[#allocation4 + $0x1e0] sm:$0xff] }
  0x52   : > { %4325 = vmatpush1.bf16.msra.mxu0 %v4324_v37  ;;  %616 = vmatprep.mubr.f32.mxu0 %v5035_v0  ;;  %v3682_v37 = vld [vmem:[%s5192_s16 + $0x20] sm:$0xff]  ;;  %v4358_v39 = vpack.c.bf16 %v1136_v36, %v1134_v35  ;;  %v1257_v57 = vld [vmem:[#allocation4 + $0x1f0] sm:$0xff]  ;;  %v1374_v58 = vld [vmem:[#allocation4 + $0x208] sm:$0xff] }
  0x53   : > { %4327 = vmatprep.subr.bf16.mxu0 %v4326_v38  ;;  %v4356_v38 = vpack.c.bf16 %v1131_v34, %v1129_v33  ;;  %v3693_v1 = vld [vmem:[%s5192_s16 + $0x39] sm:$0xf]  ;;  %v1373_v2 = vld [vmem:[#allocation4 + $0x200] sm:$0xff]  ;;  %v1375_v3 = vld [vmem:[#allocation4 + $0x210] sm:$0xff] }
  0x54   : > { %v3698_v4 = vld [vmem:[%s5192_s16 + $0x22] sm:$0xff]  ;;  %v1379_v8 = vld [vmem:[#allocation4 + $0x230] sm:$0xff]  ;;  %v3765_v10 = vld [vmem:[%s6350_s3 + $0x118] sm:$0xff] }
  0x55   : > { %3667 = vmatmul.mubr.msk.f32.gmra.mrb[2].mxu0 %vm432_vm0, %v408_v43  ;;  %v1254_v43 = vld [vmem:[#allocation4 + $0x1d8] sm:$0xff]  ;;  %v3763_v9 = vld [vmem:[%s6350_s3 + $0x108] sm:$0xff]  ;;  %v3762_v11 = vld [vmem:[%s6350_s3 + $0x100] sm:$0xff] }
  0x56   : > { %622 = vmatprep.mubr.f32.mxu0 %v5035_v0  ;;  %4329 = vmatpush1.bf16.msra.mxu0 %v4328_v44  ;;  %v3683_v44 = vld [vmem:[%s5192_s16 + $0x28] sm:$0xff]  ;;  %v3773_v25 = vld [vmem:[%s6350_s3 + $0x158] sm:$0xff]  ;;  %v1495_v36 = vld [vmem:[#allocation4 + $0x240] sm:$0xff] }
  0x57   : > { %4331 = vmatprep.subr.bf16.mxu0 %v4330_v45  ;;  %v4360_v45 = vpack.c.bf16 %v1135_v41, %v1133_v40  ;;  %v1496_v18 = vld [vmem:[#allocation4 + $0x248] sm:$0xff]  ;;  %v3700_v34 = vld [vmem:[%s5192_s16 + $0x32] sm:$0xff]  ;;  %v3701_v35 = vld [vmem:[%s5192_s16 + $0x3a] sm:$0xf] }
  0x58   : > { %v3771_v24 = vld [vmem:[%s6350_s3 + $0x148] sm:$0xff] }
  0x59   : > { %3668 = vmatmul.mubr.msk.f32.gmra.mrb[4].mxu0 %vm432_vm0, %v409_v46  ;;  %v4362_v46 = vpack.c.bf16 %v1254_v43, %v1252_v42  ;;  %v3699_v27 = vld [vmem:[%s5192_s16 + $0x2a] sm:$0xff]  ;;  %v1499_v43 = vld [vmem:[#allocation4 + $0x260] sm:$0xff] }
  0x5a   : > { %628 = vmatprep.mubr.f32.mxu0 %v5035_v0  ;;  %v3706_v40 = vld [vmem:[%s5192_s16 + $0x23] sm:$0xff] }
  0x5d   : > { %3669 = vmatmul.mubr.msk.f32.gmra.mrb[6].mxu0 %vm432_vm0, %v410_v47  ;;  %v3684_v47 = vld [vmem:[%s5192_s16 + $0x30] sm:$0xff] }
  0x5e   : > { %724 = vmatprep.mubr.f32.mxu0 %v5035_v0 }
  0x61   : > { %3670 = vmatmul.mubr.msk.f32.vlgmr.msra.gmra.mrb[0].mxu0 %vm432_vm0, %v635_v52  ;;  %v1258_v52 = vld [vmem:[#allocation4 + $0x1f8] sm:$0xff] }
  0x62   : > { %4333 = vmatpush1.bf16.msra.mxu0 %v4332_v53  ;;  %730 = vmatprep.mubr.f32.mxu0 %v5035_v0  ;;  %v3690_v53 = vld [vmem:[%s5192_s16 + $0x21] sm:$0xff]  ;;  %v4366_v55 = vpack.c.bf16 %v1258_v52, %v1256_v51  ;;  %v3709_v51 = vld [vmem:[%s5192_s16 + $0x3b] sm:$0xf] }
  0x63   : > { %4335 = vmatprep.subr.bf16.mxu0 %v4334_v54  ;;  %v4364_v54 = vpack.c.bf16 %v1253_v50, %v1251_v49  ;;  %v3708_v50 = vld [vmem:[%s5192_s16 + $0x33] sm:$0xff]  ;;  %v1618_v52 = vld [vmem:[#allocation4 + $0x280] sm:$0xff] }
  0x65   : > { %3671 = vmatmul.mubr.msk.f32.gmra.mrb[2].mxu0 %vm432_vm0, %v636_v59  ;;  %v1376_v59 = vld [vmem:[#allocation4 + $0x218] sm:$0xff] }
  0x66   : > { %736 = vmatprep.mubr.f32.mxu0 %v5035_v0  ;;  %4337 = vmatpush1.bf16.msra.mxu0 %v4336_v60  ;;  %v3691_v60 = vld [vmem:[%s5192_s16 + $0x29] sm:$0xff] }
  0x67   : > { %4339 = vmatprep.subr.bf16.mxu0 %v4338_v61  ;;  %v4368_v61 = vpack.c.bf16 %v1257_v57, %v1255_v56  ;;  %v3714_v56 = vld [vmem:[%s5192_s16 + $0x24] sm:$0xff] }
  0x69   : > { %3672 = vmatmul.mubr.msk.f32.gmra.mrb[4].mxu0 %vm432_vm0, %v637_v62  ;;  %v4370_v62 = vpack.c.bf16 %v1376_v59, %v1374_v58  ;;  %v1622_v59 = vld [vmem:[#allocation4 + $0x2a0] sm:$0xff] }
  0x6a   : > { %742 = vmatprep.mubr.f32.mxu0 %v5035_v0 }
  0x6d   : > { %3673 = vmatmul.mubr.msk.f32.gmra.mrb[6].mxu0 %vm432_vm0, %v638_v63  ;;  %v3692_v63 = vld [vmem:[%s5192_s16 + $0x31] sm:$0xff] }
  0x6e   : > { %846 = vmatprep.mubr.f32.mxu0 %v5035_v0 }
  0x71   : > { %3674 = vmatmul.mubr.msk.f32.vlgmr.msra.gmra.mrb[0].mxu0 %vm432_vm0, %v757_v5  ;;  %v1378_v5 = vld [vmem:[#allocation4 + $0x228] sm:$0xff] }
  0x72   : > { %4341 = vmatpush1.bf16.msra.mxu0 %v4340_v6  ;;  %852 = vmatprep.mubr.f32.mxu0 %v5035_v0  ;;  %v1380_v6 = vld [vmem:[#allocation4 + $0x238] sm:$0xff] }
  0x73   : > { %4343 = vmatprep.subr.bf16.mxu0 %v4342_v7  ;;  %v1377_v7 = vld [vmem:[#allocation4 + $0x220] sm:$0xff]  ;;  %v4374_v17 = vpack.c.bf16 %v1380_v6, %v1378_v5  ;;  %v1742_v6 = vld [vmem:[#allocation4 + $0x2d0] sm:$0xff] }
  0x74   : > { %v1740_v5 = vld [vmem:[#allocation4 + $0x2c0] sm:$0xff] }
  0x75   : > { %3675 = vmatmul.mubr.msk.f32.gmra.mrb[2].mxu0 %vm432_vm0, %v758_v12  ;;  %v4372_v12 = vpack.c.bf16 %v1375_v3, %v1373_v2  ;;  %v3716_v3 = vld [vmem:[%s5192_s16 + $0x34] sm:$0xff] }
  0x76   : > { %858 = vmatprep.mubr.f32.mxu0 %v5035_v0  ;;  %4345 = vmatpush1.bf16.msra.mxu0 %v4344_v13  ;;  %v4426_v13 = vpack.c.bf16 %v3765_v10, %v3763_v9  ;;  %v3722_v9 = vld [vmem:[%s5192_s16 + $0x40] sm:$0xff]  ;;  %v4396_v10 = vpack.c.bf16 %v1742_v6, %v1740_v5  ;;  %v3756_v5 = vld [vmem:[%s5192_s16 + $0x54] sm:$0xff]  ;;  %v3757_v6 = vld [vmem:[%s5192_s16 + $0x5c] sm:$0xf] }
  0x77   : > { %4347 = vmatprep.subr.bf16.mxu0 %v4346_v14  ;;  %v3764_v14 = vld [vmem:[%s6350_s3 + $0x110] sm:$0xff] }
  0x78   : > { %v4428_v19 = vpack.c.bf16 %v3764_v14, %v3762_v11  ;;  %4427 = vmatprep.subr.bf16.mxu1 %v4426_v13  ;;  %v1746_v13 = vld [vmem:[#allocation4 + $0x2f0] sm:$0xff]  ;;  %v1863_v14 = vld [vmem:[#allocation4 + $0x308] sm:$0xff] }
  0x79   : > { %3676 = vmatmul.mubr.msk.f32.gmra.mrb[4].mxu0 %vm432_vm0, %v759_v15  ;;  %v3767_v15 = vld [vmem:[%s6350_s3 + $0x128] sm:$0xff] }
  0x7a   : > { %864 = vmatprep.mubr.f32.mxu0 %v5035_v0  ;;  %4429 = vmatpush1.bf16.msra.mxu1 %v4428_v19  ;;  %v3724_v19 = vld [vmem:[%s5192_s16 + $0x50] sm:$0xff] }
  0x7d   : > { %3677 = vmatmul.mubr.msk.f32.gmra.mrb[6].mxu0 %vm432_vm0, %v760_v16  ;;  %v3769_v16 = vld [vmem:[%s6350_s3 + $0x138] sm:$0xff] }
  0x7e   : > { %968 = vmatprep.mubr.f32.mxu0 %v5035_v0  ;;  %v4430_v20 = vpack.c.bf16 %v3769_v16, %v3767_v15  ;;  %v1865_v15 = vld [vmem:[#allocation4 + $0x318] sm:$0xff]  ;;  %v3723_v16 = vld [vmem:[%s5192_s16 + $0x48] sm:$0xff] }
  0x80   : > { %4431 = vmatprep.subr.bf16.mxu1 %v4430_v20  ;;  %v3725_v20 = vld [vmem:[%s5192_s16 + $0x58] sm:$0xf] }
  0x81   : > { %3678 = vmatmul.mubr.msk.f32.vlgmr.msra.gmra.mrb[0].mxu0 %vm432_vm0, %v879_v21  ;;  %v3766_v21 = vld [vmem:[%s6350_s3 + $0x120] sm:$0xff] }
  0x82   : > { %4349 = vmatpush1.bf16.msra.mxu0 %v4348_v22  ;;  %974 = vmatprep.mubr.f32.mxu0 %v5035_v0  ;;  %v3768_v22 = vld [vmem:[%s6350_s3 + $0x130] sm:$0xff] }
  0x83   : > { %4351 = vmatprep.subr.bf16.mxu0 %v4350_v23  ;;  %v1498_v23 = vld [vmem:[#allocation4 + $0x258] sm:$0xff]  ;;  %v4432_v26 = vpack.c.bf16 %v3768_v22, %v3766_v21  ;;  %v1862_v21 = vld [vmem:[#allocation4 + $0x300] sm:$0xff]  ;;  %v1864_v22 = vld [vmem:[#allocation4 + $0x310] sm:$0xff] }
  0x85   : > { %3679 = vmatmul.mubr.msk.f32.gmra.mrb[2].mxu0 %vm432_vm0, %v880_v28  ;;  %v4376_v28 = vpack.c.bf16 %v1379_v8, %v1377_v7  ;;  %4433 = vmatpush1.bf16.msra.mxu1 %v4432_v26  ;;  %v1745_v7 = vld [vmem:[#allocation4 + $0x2e8] sm:$0xff]  ;;  %v1747_v8 = vld [vmem:[#allocation4 + $0x2f8] sm:$0xff]  ;;  %v4404_v26 = vpack.c.bf16 %v1864_v22, %v1862_v21  ;;  %v3782_v21 = vld [vmem:[%s6350_s3 + $0x1a0] sm:$0xff] }
  0x86   : > { %980 = vmatprep.mubr.f32.mxu0 %v5035_v0  ;;  %4353 = vmatpush1.bf16.msra.mxu0 %v4352_v29  ;;  %v3770_v29 = vld [vmem:[%s6350_s3 + $0x140] sm:$0xff]  ;;  %v4398_v11 = vpack.c.bf16 %v1747_v8, %v1745_v7  ;;  %v3775_v7 = vld [vmem:[%s6350_s3 + $0x168] sm:$0xff]  ;;  %v3777_v8 = vld [vmem:[%s6350_s3 + $0x178] sm:$0xff] }
  0x87   : > { %4355 = vmatprep.subr.bf16.mxu0 %v4354_v30  ;;  %v3772_v30 = vld [vmem:[%s6350_s3 + $0x150] sm:$0xff] }
  0x88   : > { %v4436_v33 = vpack.c.bf16 %v3772_v30, %v3770_v29  ;;  %v1868_v29 = vld [vmem:[#allocation4 + $0x330] sm:$0xff]  ;;  %v1985_v30 = vld [vmem:[#allocation4 + $0x348] sm:$0xff] }
  0x89   : > { %3680 = vmatmul.mubr.msk.f32.gmra.mrb[4].mxu0 %vm432_vm0, %v881_v31  ;;  %v4378_v31 = vpack.c.bf16 %v1498_v23, %v1496_v18  ;;  %v4402_v18 = vpack.c.bf16 %v1865_v15, %v1863_v14  ;;  %v1867_v23 = vld [vmem:[#allocation4 + $0x328] sm:$0xff]  ;;  %v3778_v15 = vld [vmem:[%s6350_s3 + $0x180] sm:$0xff]  ;;  %v3784_v22 = vld [vmem:[%s6350_s3 + $0x1b0] sm:$0xff] }
  0x8a   : > { %986 = vmatprep.mubr.f32.mxu0 %v5035_v0 }
  0x8d   : > { %3681 = vmatmul.mubr.msk.f32.gmra.mrb[6].mxu0 %vm432_vm0, %v882_v32  ;;  %v4434_v32 = vpack.c.bf16 %v3773_v25, %v3771_v24  ;;  %v1869_v24 = vld [vmem:[#allocation4 + $0x338] sm:$0xff]  ;;  %v3730_v25 = vld [vmem:[%s5192_s16 + $0x41] sm:$0xff] }
  0x8e   : > { %1091 = vmatprep.mubr.f32.mxu0 %v5035_v0 }
  0x8f   : > { %4435 = vmatprep.subr.bf16.mxu1 %v4434_v32  ;;  %v3731_v32 = vld [vmem:[%s5192_s16 + $0x49] sm:$0xff] }
  0x90   : > { %4437 = vmatpush1.bf16.msra.mxu1 %v4436_v33 }
  0x91   : > { %3686 = vmatmul.mubr.msk.f32.vlgmr.msra.gmra.mrb[0].mxu0 %vm432_vm0, %v3682_v37  ;;  %v1497_v37 = vld [vmem:[#allocation4 + $0x250] sm:$0xff] }
  0x92   : > { %4357 = vmatpush1.bf16.msra.mxu0 %v4356_v38  ;;  %1097 = vmatprep.mubr.f32.mxu0 %v5035_v0  ;;  %v1500_v38 = vld [vmem:[#allocation4 + $0x268] sm:$0xff]  ;;  %v4380_v41 = vpack.c.bf16 %v1497_v37, %v1495_v36  ;;  %v3733_v36 = vld [vmem:[%s5192_s16 + $0x59] sm:$0xf]  ;;  %v1984_v37 = vld [vmem:[#allocation4 + $0x340] sm:$0xff] }
  0x93   : > { %4359 = vmatprep.subr.bf16.mxu0 %v4358_v39  ;;  %v1502_v39 = vld [vmem:[#allocation4 + $0x278] sm:$0xff] }
  0x94   : > { %v4382_v42 = vpack.c.bf16 %v1502_v39, %v1500_v38  ;;  %v1986_v38 = vld [vmem:[#allocation4 + $0x350] sm:$0xff]  ;;  %v1989_v39 = vld [vmem:[#allocation4 + $0x368] sm:$0xff] }
  0x95   : > { %3687 = vmatmul.mubr.msk.f32.gmra.mrb[2].mxu0 %vm432_vm0, %v3683_v44  ;;  %v1501_v44 = vld [vmem:[#allocation4 + $0x270] sm:$0xff] }
  0x96   : > { %1103 = vmatprep.mubr.f32.mxu0 %v5035_v0  ;;  %4361 = vmatpush1.bf16.msra.mxu0 %v4360_v45  ;;  %v1619_v45 = vld [vmem:[#allocation4 + $0x288] sm:$0xff] }
  0x97   : > { %4363 = vmatprep.subr.bf16.mxu0 %v4362_v46  ;;  %v1621_v46 = vld [vmem:[#allocation4 + $0x298] sm:$0xff] }
  0x98   : > { %v4386_v49 = vpack.c.bf16 %v1621_v46, %v1619_v45  ;;  %v1990_v45 = vld [vmem:[#allocation4 + $0x370] sm:$0xff]  ;;  %v2107_v46 = vld [vmem:[#allocation4 + $0x388] sm:$0xff] }
  0x99   : > { %3688 = vmatmul.mubr.msk.f32.gmra.mrb[4].mxu0 %vm432_vm0, %v3684_v47  ;;  %v3707_v47 = vld [vmem:[%s5192_s16 + $0x2b] sm:$0xff] }
  0x9a   : > { %1109 = vmatprep.mubr.f32.mxu0 %v5035_v0 }
  0x9d   : > { %3689 = vmatmul.mubr.msk.f32.gmra.mrb[6].mxu0 %vm432_vm0, %v3685_v48  ;;  %v4384_v48 = vpack.c.bf16 %v1501_v44, %v1499_v43  ;;  %v1988_v44 = vld [vmem:[#allocation4 + $0x360] sm:$0xff] }
  0x9e   : > { %1213 = vmatprep.mubr.f32.mxu0 %v5035_v0 }
  0xa1   : > { %3694 = vmatmul.mubr.msk.f32.vlgmr.msra.gmra.mrb[0].mxu0 %vm432_vm0, %v3690_v53  ;;  %v1620_v53 = vld [vmem:[#allocation4 + $0x290] sm:$0xff] }
  0xa2   : > { %4365 = vmatpush1.bf16.msra.mxu0 %v4364_v54  ;;  %1219 = vmatprep.mubr.f32.mxu0 %v5035_v0  ;;  %v1623_v54 = vld [vmem:[#allocation4 + $0x2a8] sm:$0xff]  ;;  %v4388_v57 = vpack.c.bf16 %v1620_v53, %v1618_v52  ;;  %v3741_v52 = vld [vmem:[%s5192_s16 + $0x5a] sm:$0xf]  ;;  %v2106_v53 = vld [vmem:[#allocation4 + $0x380] sm:$0xff] }
  0xa3   : > { %4367 = vmatprep.subr.bf16.mxu0 %v4366_v55  ;;  %v1625_v55 = vld [vmem:[#allocation4 + $0x2b8] sm:$0xff] }
  0xa4   : > { %v4390_v58 = vpack.c.bf16 %v1625_v55, %v1623_v54  ;;  %v2108_v54 = vld [vmem:[#allocation4 + $0x390] sm:$0xff]  ;;  %v2111_v55 = vld [vmem:[#allocation4 + $0x3a8] sm:$0xff] }
  0xa5   : > { %3695 = vmatmul.mubr.msk.f32.gmra.mrb[2].mxu0 %vm432_vm0, %v3691_v60  ;;  %v1624_v60 = vld [vmem:[#allocation4 + $0x2b0] sm:$0xff] }
  0xa6   : > { %1225 = vmatprep.mubr.f32.mxu0 %v5035_v0  ;;  %4369 = vmatpush1.bf16.msra.mxu0 %v4368_v61  ;;  %v1741_v61 = vld [vmem:[#allocation4 + $0x2c8] sm:$0xff] }
  0xa7   : > { %4371 = vmatprep.subr.bf16.mxu0 %v4370_v62  ;;  %v1743_v62 = vld [vmem:[#allocation4 + $0x2d8] sm:$0xff] }
  0xa8   : > { %v4394_v2 = vpack.c.bf16 %v1743_v62, %v1741_v61  ;;  %v2112_v61 = vld [vmem:[#allocation4 + $0x3b0] sm:$0xff] }
  0xa9   : > { %3696 = vmatmul.mubr.msk.f32.gmra.mrb[4].mxu0 %vm432_vm0, %v3692_v63  ;;  %v3715_v63 = vld [vmem:[%s5192_s16 + $0x2c] sm:$0xff] }
  0xaa   : > { %1231 = vmatprep.mubr.f32.mxu0 %v5035_v0  ;;  %v3747_v62 = vld [vmem:[%s5192_s16 + $0x4b] sm:$0xff] }
  0xad   : > { %3697 = vmatmul.mubr.msk.f32.gmra.mrb[6].mxu0 %vm432_vm0, %v3693_v1  ;;  %v4392_v1 = vpack.c.bf16 %v1624_v60, %v1622_v59  ;;  %v2110_v60 = vld [vmem:[#allocation4 + $0x3a0] sm:$0xff] }
  0xae   : > { %1335 = vmatprep.mubr.f32.mxu0 %v5035_v0 }
  0xb1   : > { %3702 = vmatmul.mubr.msk.f32.vlgmr.msra.gmra.mrb[0].mxu0 %vm432_vm0, %v3698_v4  ;;  %v3717_v4 = vld [vmem:[%s5192_s16 + $0x3c] sm:$0xf] }
  0xb2   : > { %4373 = vmatpush1.bf16.msra.mxu0 %v4372_v12  ;;  %1341 = vmatprep.mubr.f32.mxu0 %v5035_v0  ;;  %v1744_v12 = vld [vmem:[#allocation4 + $0x2e0] sm:$0xff] }
  0xb3   : > { %4375 = vmatprep.subr.bf16.mxu0 %v4374_v17  ;;  %v4400_v17 = vpack.c.bf16 %v1746_v13, %v1744_v12  ;;  %v3779_v12 = vld [vmem:[%s6350_s3 + $0x188] sm:$0xff]  ;;  %v3781_v13 = vld [vmem:[%s6350_s3 + $0x198] sm:$0xff] }
  0xb4   : > { %v4442_v14 = vpack.c.bf16 %v3781_v13, %v3779_v12  ;;  %v2269_v13 = vld [vmem:[%s6350_s3 + $0x30] sm:$0xff] }
  0xb5   : > { %3703 = vmatmul.mubr.msk.f32.gmra.mrb[2].mxu0 %vm432_vm0, %v3699_v27  ;;  %v4406_v27 = vpack.c.bf16 %v1869_v24, %v1867_v23  ;;  %v4448_v23 = vpack.c.bf16 %v3784_v22, %v3782_v21  ;;  %v3787_v24 = vld [vmem:[%s6350_s3 + $0x1c8] sm:$0xff]  ;;  %v5519_v21 = vld [vmem:[#allocation3 + $0x18] sm:$0xff] }
  0xb6   : > { %1347 = vmatprep.mubr.f32.mxu0 %v5035_v0  ;;  %4377 = vmatpush1.bf16.msra.mxu0 %v4376_v28  ;;  %v1866_v28 = vld [vmem:[#allocation4 + $0x320] sm:$0xff] }
  0xb7   : > { %4379 = vmatprep.subr.bf16.mxu0 %v4378_v31  ;;  %v1987_v31 = vld [vmem:[#allocation4 + $0x358] sm:$0xff]  ;;  %v4408_v33 = vpack.c.bf16 %v1868_v29, %v1866_v28  ;;  %v3788_v28 = vld [vmem:[%s6350_s3 + $0x1d0] sm:$0xff] }
  0xb9   : > { %3704 = vmatmul.mubr.msk.f32.gmra.mrb[4].mxu0 %vm432_vm0, %v3700_v34  ;;  %v4410_v34 = vpack.c.bf16 %v1987_v31, %v1985_v30  ;;  %v3791_v30 = vld [vmem:[%s6350_s3 + $0x1e8] sm:$0xff]  ;;  %v3793_v31 = vld [vmem:[%s6350_s3 + $0x1f8] sm:$0xff] }
  0xba   : > { %1353 = vmatprep.mubr.f32.mxu0 %v5035_v0 }
  0xbd   : > { %3705 = vmatmul.mubr.msk.f32.gmra.mrb[6].mxu0 %vm432_vm0, %v3701_v35  ;;  %v3732_v35 = vld [vmem:[%s5192_s16 + $0x51] sm:$0xff] }
  0xbe   : > { %1457 = vmatprep.mubr.f32.mxu0 %v5035_v0 }
  0xc1   : > { %3710 = vmatmul.mubr.msk.f32.vlgmr.msra.gmra.mrb[0].mxu0 %vm432_vm0, %v3706_v40  ;;  %v1991_v40 = vld [vmem:[#allocation4 + $0x378] sm:$0xff] }
  0xc2   : > { %4381 = vmatpush1.bf16.msra.mxu0 %v4380_v41  ;;  %1463 = vmatprep.mubr.f32.mxu0 %v5035_v0  ;;  %v3738_v41 = vld [vmem:[%s5192_s16 + $0x42] sm:$0xff]  ;;  %v4414_v43 = vpack.c.bf16 %v1991_v40, %v1989_v39  ;;  %v2225_v39 = vlaneseq }
  0xc3   : > { %4383 = vmatprep.subr.bf16.mxu0 %v4382_v42  ;;  %v4412_v42 = vpack.c.bf16 %v1986_v38, %v1984_v37  ;;  %v2266_v37 = vld [vmem:[%s6350_s3 + $0x18] sm:$0xff] }
  0xc4   : > { %v5475_v40 = vshrl.u32 %v2225_v39, 7  ;;  %v3923_v39 = vld [vmem:[%s6352_s5 + $0x188] sm:$0xff] }
  0xc5   : > { %3711 = vmatmul.mubr.msk.f32.gmra.mrb[2].mxu0 %vm432_vm0, %v3707_v47  ;;  %v2109_v47 = vld [vmem:[#allocation4 + $0x398] sm:$0xff] }
  0xc6   : > { %1469 = vmatprep.mubr.f32.mxu0 %v5035_v0  ;;  %4385 = vmatpush1.bf16.msra.mxu0 %v4384_v48  ;;  %v3739_v48 = vld [vmem:[%s5192_s16 + $0x4a] sm:$0xff] }
  0xc7   : > { %4387 = vmatprep.subr.bf16.mxu0 %v4386_v49  ;;  %v4416_v49 = vpack.c.bf16 %v1990_v45, %v1988_v44 }
  0xc9   : > { %3712 = vmatmul.mubr.msk.f32.gmra.mrb[4].mxu0 %vm432_vm0, %v3708_v50  ;;  %v4418_v50 = vpack.c.bf16 %v2109_v47, %v2107_v46 }
  0xca   : > { %1475 = vmatprep.mubr.f32.mxu0 %v5035_v0 }
  0xcd   : > { %3713 = vmatmul.mubr.msk.f32.gmra.mrb[6].mxu0 %vm432_vm0, %v3709_v51  ;;  %v3740_v51 = vld [vmem:[%s5192_s16 + $0x52] sm:$0xff] }
  0xce   : > { %1579 = vmatprep.mubr.f32.mxu0 %v5035_v0 }
  0xd1   : > { %3718 = vmatmul.mubr.msk.f32.vlgmr.msra.gmra.mrb[0].mxu0 %vm432_vm0, %v3714_v56  ;;  %v2113_v56 = vld [vmem:[#allocation4 + $0x3b8] sm:$0xff] }
  0xd2   : > { %4389 = vmatpush1.bf16.msra.mxu0 %v4388_v57  ;;  %1585 = vmatprep.mubr.f32.mxu0 %v5035_v0  ;;  %v3746_v57 = vld [vmem:[%s5192_s16 + $0x43] sm:$0xff]  ;;  %v4422_v59 = vpack.c.bf16 %v2113_v56, %v2111_v55 }
  0xd3   : > { %4391 = vmatprep.subr.bf16.mxu0 %v4390_v58  ;;  %v4420_v58 = vpack.c.bf16 %v2108_v54, %v2106_v53 }
  0xd5   : > { %3719 = vmatmul.mubr.msk.f32.gmra.mrb[2].mxu0 %vm432_vm0, %v3715_v63  ;;  %v4424_v63 = vpack.c.bf16 %v2112_v61, %v2110_v60 }
  0xd6   : > { %1591 = vmatprep.mubr.f32.mxu0 %v5035_v0  ;;  %4393 = vmatpush1.bf16.msra.mxu0 %v4392_v1  ;;  %v3748_v1 = vld [vmem:[%s5192_s16 + $0x53] sm:$0xff] }
  0xd7   : > { %4395 = vmatprep.subr.bf16.mxu0 %v4394_v2  ;;  %v3749_v2 = vld [vmem:[%s5192_s16 + $0x5b] sm:$0xf] }
  0xd9   : > { %3720 = vmatmul.mubr.msk.f32.gmra.mrb[4].mxu0 %vm432_vm0, %v3716_v3  ;;  %v3754_v3 = vld [vmem:[%s5192_s16 + $0x44] sm:$0xff] }
  0xda   : > { %1597 = vmatprep.mubr.f32.mxu0 %v5035_v0 }
  0xdd   : > { %3721 = vmatmul.mubr.msk.f32.gmra.mrb[6].mxu0 %vm432_vm0, %v3717_v4  ;;  %v3755_v4 = vld [vmem:[%s5192_s16 + $0x4c] sm:$0xff]  ;;  %s3576_s16 = scalar_lea.sflag [#allocation6], %s392_s15 }
  0xde   : > { %1702 = vmatprep.mubr.f32.mxu0 %v5035_v0 }
  0xe1   : > { %3726 = vmatmul.mubr.msk.f32.vlgmr.msra.gmra.mrb[0].mxu0 %vm432_vm0, %v3722_v9  ;;  %v4438_v9 = vpack.c.bf16 %v3777_v8, %v3775_v7  ;;  %v2270_v8 = vld [vmem:[%s6350_s3 + $0x38] sm:$0xff] }
  0xe2   : > { %4397 = vmatpush1.bf16.msra.mxu0 %v4396_v10  ;;  %1708 = vmatprep.mubr.f32.mxu0 %v5035_v0  ;;  %v3774_v10 = vld [vmem:[%s6350_s3 + $0x160] sm:$0xff] }
  0xe3   : > { %4399 = vmatprep.subr.bf16.mxu0 %v4398_v11  ;;  %4439 = vmatprep.subr.bf16.mxu1 %v4438_v9 }
  0xe5   : > { %3727 = vmatmul.mubr.msk.f32.gmra.mrb[2].mxu0 %vm432_vm0, %v3723_v16  ;;  %v3780_v16 = vld [vmem:[%s6350_s3 + $0x190] sm:$0xff] }
  0xe6   : > { %1714 = vmatprep.mubr.f32.mxu0 %v5035_v0  ;;  %4401 = vmatpush1.bf16.msra.mxu0 %v4400_v17  ;;  %v4444_v17 = vpack.c.bf16 %v3780_v16, %v3778_v15  ;;  %v2274_v15 = vld [vmem:[%s6350_s3 + $0x58] sm:$0xff] }
  0xe7   : > { %4403 = vmatprep.subr.bf16.mxu0 %v4402_v18  ;;  %v3783_v18 = vld [vmem:[%s6350_s3 + $0x1a8] sm:$0xff] }
  0xe9   : > { %3728 = vmatmul.mubr.msk.f32.gmra.mrb[4].mxu0 %vm432_vm0, %v3724_v19  ;;  %v3785_v19 = vld [vmem:[%s6350_s3 + $0x1b8] sm:$0xff] }
  0xea   : > { %1720 = vmatprep.mubr.f32.mxu0 %v5035_v0 }
  0xed   : > { %3729 = vmatmul.mubr.msk.f32.gmra.mrb[6].mxu0 %vm432_vm0, %v3725_v20  ;;  %v4446_v20 = vpack.c.bf16 %v3785_v19, %v3783_v18 }
  0xee   : > { %1824 = vmatprep.mubr.f32.mxu0 %v5035_v0 }
  0xf1   : > { %3734 = vmatmul.mubr.msk.f32.vlgmr.msra.gmra.mrb[0].mxu0 %vm432_vm0, %v3730_v25  ;;  %v3789_v25 = vld [vmem:[%s6350_s3 + $0x1d8] sm:$0xff] }
  0xf2   : > { %4405 = vmatpush1.bf16.msra.mxu0 %v4404_v26  ;;  %1830 = vmatprep.mubr.f32.mxu0 %v5035_v0  ;;  %v4450_v26 = vpack.c.bf16 %v3789_v25, %v3787_v24 }
  0xf3   : > { %4407 = vmatprep.subr.bf16.mxu0 %v4406_v27  ;;  %v3786_v27 = vld [vmem:[%s6350_s3 + $0x1c0] sm:$0xff] }
  0xf4   : > { %v4452_v29 = vpack.c.bf16 %v3788_v28, %v3786_v27  ;;  %v2273_v27 = vld [vmem:[%s6350_s3 + $0x50] sm:$0xff]  ;;  %v2276_v28 = vld [vmem:[%s6350_s3 + $0x68] sm:$0xff] }
  0xf5   : > { %3735 = vmatmul.mubr.msk.f32.gmra.mrb[2].mxu0 %vm432_vm0, %v3731_v32  ;;  %v4454_v32 = vpack.c.bf16 %v3793_v31, %v3791_v30 }
  0xf6   : > { %1836 = vmatprep.mubr.f32.mxu0 %v5035_v0  ;;  %4409 = vmatpush1.bf16.msra.mxu0 %v4408_v33  ;;  %v3790_v33 = vld [vmem:[%s6350_s3 + $0x1e0] sm:$0xff] }
  0xf7   : > { %4411 = vmatprep.subr.bf16.mxu0 %v4410_v34  ;;  %v3792_v34 = vld [vmem:[%s6350_s3 + $0x1f0] sm:$0xff] }
  0xf9   : > { %3736 = vmatmul.mubr.msk.f32.gmra.mrb[4].mxu0 %vm432_vm0, %v3732_v35  ;;  %v4456_v35 = vpack.c.bf16 %v3792_v34, %v3790_v33  ;;  %v2275_v33 = vld [vmem:[%s6350_s3 + $0x60] sm:$0xff]  ;;  %v2277_v34 = vld [vmem:[%s6350_s3 + $0x70] sm:$0xff] }
  0xfa   : > { %1842 = vmatprep.mubr.f32.mxu0 %v5035_v0 }
  0xfd   : > { %3737 = vmatmul.mubr.msk.f32.gmra.mrb[6].mxu0 %vm432_vm0, %v3733_v36  ;;  %v2264_v36 = vld [vmem:[%s6350_s3 + $0x8] sm:$0xff] }
  0xfe   : > { %1946 = vmatprep.mubr.f32.mxu0 %v5035_v0  ;;  %v4458_v38 = vpack.c.bf16 %v2266_v37, %v2264_v36  ;;  %v2282_v36 = vld [vmem:[%s6350_s3 + $0x98] sm:$0xff]  ;;  %v4472_v37 = vpack.c.bf16 %v2277_v34, %v2275_v33 }
 0x101   : > { %3742 = vmatmul.mubr.msk.f32.vlgmr.msra.gmra.mrb[0].mxu0 %vm432_vm0, %v3738_v41  ;;  %v2227_v41 = vsub.s32 0, %v5475_v40 }
 0x102   : > { %4413 = vmatpush1.bf16.msra.mxu0 %v4412_v42  ;;  %1952 = vmatprep.mubr.f32.mxu0 %v5035_v0  ;;  %v2223_v42 = vld [vmem:[%s6349_s2] sm:$0x3] }
 0x103   : > { %4415 = vmatprep.subr.bf16.mxu0 %v4414_v43  ;;  %v2231_v43 = vsub.s32 1, %v5475_v40  ;;  %v2228_v44 = vrot.slane %v2223_v42, %v2227_v41  ;;  %v2936_v40 = vld [vmem:[%s6352_s5] sm:$0xff] }
 0x105   : > { %3743 = vmatmul.mubr.msk.f32.gmra.mrb[2].mxu0 %vm432_vm0, %v3739_v48  ;;  %v2232_v45 = vrot.slane %v2223_v42, %v2231_v43 }
 0x106   : > { %1958 = vmatprep.mubr.f32.mxu0 %v5035_v0  ;;  %4417 = vmatpush1.bf16.msra.mxu0 %v4416_v49 }
 0x107   : > { %4419 = vmatprep.subr.bf16.mxu0 %v4418_v50 }
 0x109   : > { %3744 = vmatmul.mubr.msk.f32.gmra.mrb[4].mxu0 %vm432_vm0, %v3740_v51 }
 0x10a   : > { %1964 = vmatprep.mubr.f32.mxu0 %v5035_v0 }
 0x10d   : > { %3745 = vmatmul.mubr.msk.f32.gmra.mrb[6].mxu0 %vm432_vm0, %v3741_v52 }
 0x10e   : > { %2068 = vmatprep.mubr.f32.mxu0 %v5035_v0 }
 0x111   : > { %3750 = vmatmul.mubr.msk.f32.vlgmr.msra.gmra.mrb[0].mxu0 %vm432_vm0, %v3746_v57 }
 0x112   : > { %4421 = vmatpush1.bf16.msra.mxu0 %v4420_v58  ;;  %2074 = vmatprep.mubr.f32.mxu0 %v5035_v0 }
 0x113   : > { %4423 = vmatprep.subr.bf16.mxu0 %v4422_v59 }
 0x115   : > { %3751 = vmatmul.mubr.msk.f32.gmra.mrb[2].mxu0 %vm432_vm0, %v3747_v62 }
 0x116   : > { %2080 = vmatprep.mubr.f32.mxu0 %v5035_v0  ;;  %4425 = vmatpush1.bf16.msra.mxu0 %v4424_v63 }
 0x119   : > { %3752 = vmatmul.mubr.msk.f32.gmra.mrb[4].mxu0 %vm432_vm0, %v3748_v1 }
 0x11a   : > { %2086 = vmatprep.mubr.f32.mxu0 %v5035_v0 }
 0x11d   : > { %3753 = vmatmul.mubr.msk.f32.gmra.mrb[6].mxu0 %vm432_vm0, %v3749_v2 }
 0x11e   : > { %2190 = vmatprep.mubr.f32.mxu0 %v5035_v0 }
 0x121   : > { %3758 = vmatmul.mubr.msk.f32.vlgmr.msra.gmra.mrb[0].mxu0 %vm432_vm0, %v3754_v3  ;;  %v2263_v3 = vld [vmem:[%s6350_s3] sm:$0xff] }
 0x122   : > { %2196 = vmatprep.mubr.f32.mxu0 %v5035_v0 }
 0x125   : > { %3759 = vmatmul.mubr.msk.f32.gmra.mrb[2].mxu0 %vm432_vm0, %v3755_v4  ;;  %v2265_v4 = vld [vmem:[%s6350_s3 + $0x10] sm:$0xff] }
 0x126   : > { %2202 = vmatprep.mubr.f32.mxu0 %v5035_v0 }
 0x129   : > { %3760 = vmatmul.mubr.msk.f32.gmra.mrb[4].mxu0 %vm432_vm0, %v3756_v5  ;;  %v2268_v5 = vld [vmem:[%s6350_s3 + $0x28] sm:$0xff] }
 0x12a   : > { %2208 = vmatprep.mubr.f32.mxu0 %v5035_v0  ;;  %v3776_v0 = vld [vmem:[%s6350_s3 + $0x170] sm:$0xff]  ;;  %v4462_v12 = vpack.c.bf16 %v2270_v8, %v2268_v5 }
 0x12b   : > { %v4440_v11 = vpack.c.bf16 %v3776_v0, %v3774_v10  ;;  %v4460_v10 = vpack.c.bf16 %v2265_v4, %v2263_v3  ;;  %v2267_v0 = vld [vmem:[%s6350_s3 + $0x20] sm:$0xff]  ;;  %v2289_v5 = vld [vmem:[%s6350_s3 + $0xd0] sm:$0xff] }
 0x12c   : > { %v4464_v22 = vpack.c.bf16 %v2269_v13, %v2267_v0  ;;  %v2287_v4 = vld [vmem:[%s6350_s3 + $0xc0] sm:$0xff]  ;;  %v2293_v0 = vld [vmem:[%s6350_s3 + $0xf0] sm:$0xff]  ;;  %v3797_v13 = vld [vmem:[%s6350_s3 + $0x218] sm:$0xff] }
 0x12d   : > { %3761 = vmatmul.mubr.msk.f32.gmra.mrb[6].mxu0 %vm432_vm0, %v3757_v6  ;;  %4441 = vmatpush1.bf16.msra.mxu1 %v4440_v11  ;;  %v4484_v8 = vpack.c.bf16 %v2289_v5, %v2287_v4  ;;  %v3818_v4 = vld [vmem:[%s6350_s3 + $0x2c0] sm:$0xff]  ;;  %v3820_v5 = vld [vmem:[%s6350_s3 + $0x2d0] sm:$0xff] }
 0x12e   : > { %4443 = vmatprep.subr.bf16.mxu1 %v4442_v14  ;;  %v2272_v14 = vld [vmem:[%s6350_s3 + $0x48] sm:$0xff]  ;;  %4210 = vmatprep.mubr.msk.f32.mxu0 %vm5037_vm1, %v5519_v21 }
 0x12f   : > { %v4466_v24 = vpack.c.bf16 %v2274_v15, %v2272_v14 }
 0x131   : > { %4445 = vmatpush1.bf16.msra.mxu1 %v4444_v17 }
 0x132   : > { %4447 = vmatprep.subr.bf16.mxu1 %v4446_v20 }
 0x135   : > { %4449 = vmatpush1.bf16.msra.mxu1 %v4448_v23 }
 0x136   : > { %4451 = vmatprep.subr.bf16.mxu1 %v4450_v26  ;;  %v2271_v26 = vld [vmem:[%s6350_s3 + $0x40] sm:$0xff] }
 0x137   : > { %v4468_v30 = vpack.c.bf16 %v2273_v27, %v2271_v26  ;;  %v3798_v26 = vld [vmem:[%s6350_s3 + $0x220] sm:$0xff]  ;;  %v3800_v27 = vld [vmem:[%s6350_s3 + $0x230] sm:$0xff] }
 0x139   : > { %4453 = vmatpush1.bf16.msra.mxu1 %v4452_v29  ;;  %v2278_v29 = vld [vmem:[%s6350_s3 + $0x78] sm:$0xff] }
 0x13a   : > { %4455 = vmatprep.subr.bf16.mxu1 %v4454_v32  ;;  %v4470_v32 = vpack.c.bf16 %v2278_v29, %v2276_v28  ;;  %v3803_v28 = vld [vmem:[%s6350_s3 + $0x248] sm:$0xff] }
 0x13d   : > { %4457 = vmatpush1.bf16.msra.mxu1 %v4456_v35  ;;  %v2280_v35 = vld [vmem:[%s6350_s3 + $0x88] sm:$0xff] }
 0x13e   : > { %4459 = vmatprep.subr.bf16.mxu1 %v4458_v38  ;;  %v3922_v38 = vld [vmem:[%s6352_s5 + $0x180] sm:$0xff]  ;;  %v4474_v42 = vpack.c.bf16 %v2282_v36, %v2280_v35  ;;  %v3804_v36 = vld [vmem:[%s6350_s3 + $0x250] sm:$0xff] }
 0x13f   : > { %v3802_v35 = vld [vmem:[%s6350_s3 + $0x240] sm:$0xff] }
 0x1f4   : > { %v2192_v46 = vpop.f32.mrb[0].mxu0 }
 0x1f5   : > { %v2235_v47 = vadd.f32 %v2228_v44, %v2192_v46  ;;  %v2194_v48 = vpop.f32.mrb[1].mxu0  ;;  %v5036_v46 = vmov 0.0|0.0  }
 0x1f6   : > { %v2236_v49 = vadd.f32 %v2232_v45, %v2194_v48  ;;  %4658 = vmatprep.subr.bf16.mxu0 %v5036_v46  ;;  %v3924_v48 = vld [vmem:[%s6352_s5 + $0x190] sm:$0xff] }
 0x1f8   : > { %v5486_v50 = vmax.f32 %v2235_v47, %v2236_v49  ;;  %v2198_v51 = vpop.f32.mrb[2].mxu0  ;;  %v4659_v47 = vpack.c.bf16 %v3923_v39, %v3922_v38  ;;  %v2284_v49 = vld [vmem:[%s6350_s3 + $0xa8] sm:$0xff]  ;;  %v3809_v38 = vld [vmem:[%s6350_s3 + $0x278] sm:$0xff]  ;;  %v4500_v39 = vpack.c.bf16 %v3804_v36, %v3802_v35 }
 0x1f9   : > { %v2237_v52 = vadd.f32 %v2228_v44, %v2198_v51  ;;  %v2200_v53 = vpop.f32.mrb[3].mxu0  ;;  %v2286_v51 = vld [vmem:[%s6350_s3 + $0xb8] sm:$0xff] }
 0x1fa   : > { %2247 = vst [vmem:[#allocation2] sm:$0xff] %v5486_v50  ;;  %v2238_v54 = vadd.f32 %v2232_v45, %v2200_v53  ;;  %4660 = vmatpush3.bf16.msra.mxu0 %v4659_v47  ;;  %v3808_v47 = vld [vmem:[%s6350_s3 + $0x270] sm:$0xff] }
 0x1fb   : > { %4661 = vmatprep.subr.bf16.mxu0 %v5036_v46 }
 0x1fc   : > { %v5489_v55 = vmax.f32 %v2237_v52, %v2238_v54  ;;  %v2204_v56 = vpop.f32.mrb[4].mxu0  ;;  %v3925_v52 = vld [vmem:[%s6352_s5 + $0x198] sm:$0xff] }
 0x1fd   : > { %v2239_v57 = vadd.f32 %v2228_v44, %v2204_v56  ;;  %v2206_v58 = vpop.f32.mrb[5].mxu0  ;;  %v4662_v53 = vpack.c.bf16 %v3925_v52, %v3924_v48  ;;  %v3926_v56 = vld [vmem:[%s6352_s5 + $0x1a0] sm:$0xff]  ;;  %v3811_v48 = vld [vmem:[%s6350_s3 + $0x288] sm:$0xff] }
 0x1fe   : > { %2248 = vst [vmem:[#allocation2 + $0x8] sm:$0xff] %v5489_v55  ;;  %v2240_v59 = vadd.f32 %v2232_v45, %v2206_v58  ;;  %v4478_v58 = vpack.c.bf16 %v2286_v51, %v2284_v49  ;;  %v3813_v49 = vld [vmem:[%s6350_s3 + $0x298] sm:$0xff] }
 0x1ff   : > { %4663 = vmatpush3.bf16.msra.mxu0 %v4662_v53  ;;  %v4506_v52 = vpack.c.bf16 %v3813_v49, %v3811_v48  ;;  %v3810_v53 = vld [vmem:[%s6350_s3 + $0x280] sm:$0xff] }
 0x200   : > { %v5492_v60 = vmax.f32 %v2239_v57, %v2240_v59  ;;  %v2210_v61 = vpop.f32.mrb[6].mxu0  ;;  %v3927_v57 = vld [vmem:[%s6352_s5 + $0x1a8] sm:$0xff]  ;;  %v2283_v59 = vld [vmem:[%s6350_s3 + $0xa0] sm:$0xff]  ;;  %4664 = vmatprep.subr.bf16.mxu0 %v5036_v46 }
 0x201   : > { %v2241_v62 = vadd.f32 %v2228_v44, %v2210_v61  ;;  %v2212_v63 = vpop.f32.mrb[7].mxu0  ;;  %v2279_v44 = vld [vmem:[%s6350_s3 + $0x80] sm:$0xff]  ;;  %v2285_v61 = vld [vmem:[%s6350_s3 + $0xb0] sm:$0xff] }
 0x202   : > { %2249 = vst [vmem:[#allocation2 + $0x10] sm:$0xff] %v5492_v60  ;;  %v2242_v1 = vadd.f32 %v2232_v45, %v2212_v63  ;;  %v2281_v45 = vld [vmem:[%s6350_s3 + $0x90] sm:$0xff]  ;;  %v2290_v63 = vld [vmem:[%s6350_s3 + $0xd8] sm:$0xff]  ;;  %v3838_v49 = vld [vmem:[%s6350_s3 + $0x360] sm:$0xff] }
 0x203   : > { %v4476_v54 = vpack.c.bf16 %v2281_v45, %v2279_v44  ;;  %v3806_v45 = vld [vmem:[%s6350_s3 + $0x260] sm:$0xff] }
 0x204   : > { %v2246_v2 = vmax.f32 %v2241_v62, %v2242_v1  ;;  %v2288_v62 = vld [vmem:[%s6350_s3 + $0xc8] sm:$0xff]  ;;  %v4665_v1 = vpack.c.bf16 %v3927_v57, %v3926_v56  ;;  %v4504_v51 = vpack.c.bf16 %v3808_v47, %v3806_v45  ;;  %v3817_v57 = vld [vmem:[%s6350_s3 + $0x2b8] sm:$0xff] }
 0x205   : > { %v2295_v6 = vld [vmem:[#allocation2 + $0x2] sm:$0xff]  ;;  %v4482_v3 = vpack.c.bf16 %v2290_v63, %v2288_v62  ;;  %v3816_v62 = vld [vmem:[%s6350_s3 + $0x2b0] sm:$0xff] }
 0x206   : > { %v2298_v7 = vld [vmem:[#allocation2 + $0x3] sm:$0xff]  ;;  %2250 = vst [vmem:[#allocation2 + $0x18] sm:$0xf] %v2246_v2  ;;  %v4480_v2 = vpack.c.bf16 %v2285_v61, %v2283_v59  ;;  %4666 = vmatpush3.bf16.msra.mxu0 %v4665_v1  ;;  %v3821_v1 = vld [vmem:[%s6350_s3 + $0x2d8] sm:$0xff] }
 0x207   : > { %v2301_v9 = vmax.f32 %v2295_v6, %v2298_v7  ;;  %v2292_v6 = vld [vmem:[%s6350_s3 + $0xe8] sm:$0xff]  ;;  %v2294_v7 = vld [vmem:[%s6350_s3 + $0xf8] sm:$0xff]  ;;  %4667 = vmatprep.subr.bf16.mxu0 %v5036_v46  ;;  %v3814_v61 = vld [vmem:[%s6350_s3 + $0x2a0] sm:$0xff] }
 0x208   : > { %v3815_v56 = vld [vmem:[%s6350_s3 + $0x2a8] sm:$0xff] }
 0x209   : > { %v2304_v11 = vmax.f32 %v2301_v9, 0.0  ;;  %v2296_v16 = vld [vmem:[#allocation2 + $0xa] sm:$0xff]  ;;  %v2297_v18 = vld [vmem:[#allocation2 + $0x12] sm:$0x7]  ;;  %v4486_v9 = vpack.c.bf16 %v2294_v7, %v2292_v6  ;;  %v4510_v59 = vpack.c.bf16 %v3817_v57, %v3815_v56  ;;  %v3825_v7 = vld [vmem:[%s6350_s3 + $0x2f8] sm:$0xff] }
 0x20a   : > { %v2299_v17 = vld [vmem:[#allocation2 + $0xb] sm:$0xff]  ;;  %v2300_v20 = vld [vmem:[#allocation2 + $0x13] sm:$0x7]  ;;  %v3842_v57 = vld [vmem:[%s6350_s3 + $0x380] sm:$0xff] }
 0x20b   : > { %2405 = vmatmul.mubr.f32.vlgmr.msra.gmra.mrb[0].mxu1 %v2304_v11  ;;  %v2302_v19 = vmax.f32 %v2296_v16, %v2299_v17  ;;  %v2303_v25 = vmax.f32 %v2297_v18, %v2300_v20  ;;  %v2254_v11 = vld [vmem:[#allocation2 + $0x1] sm:$0xff]  ;;  %v3796_v18 = vld [vmem:[%s6350_s3 + $0x210] sm:$0xff] }
 0x20c   : > { %4461 = vmatpush1.bf16.msra.mxu1 %v4460_v10  ;;  %2410 = vmatprep.mubr.f32.mxu1 %v5519_v21  ;;  %v2291_v10 = vld [vmem:[%s6350_s3 + $0xe0] sm:$0xff]  ;;  %v2257_v15 = vmax.f32 %v5486_v50, %v2254_v11  ;;  %v3799_v20 = vld [vmem:[%s6350_s3 + $0x228] sm:$0xff]  ;;  %v2253_v29 = vld [vmem:[#allocation2 + $0x10] sm:$0x7] }
 0x20d   : > { %4463 = vmatprep.subr.bf16.mxu1 %v4462_v12  ;;  %v2305_v23 = vmax.f32 %v2302_v19, 0.0  ;;  %v2306_v31 = vmax.f32 %v2303_v25, 0.0  ;;  %v3795_v12 = vld [vmem:[%s6350_s3 + $0x208] sm:$0xff]  ;;  %v4488_v14 = vpack.c.bf16 %v2293_v0, %v2291_v10  ;;  %v3794_v17 = vld [vmem:[%s6350_s3 + $0x200] sm:$0xff]  ;;  %v3824_v0 = vld [vmem:[%s6350_s3 + $0x2f0] sm:$0xff] }
 0x20e   : > { %v4490_v16 = vpack.c.bf16 %v3797_v13, %v3795_v12  ;;  %v2255_v19 = vld [vmem:[#allocation2 + $0x9] sm:$0xff]  ;;  %v4492_v50 = vpack.c.bf16 %v3796_v18, %v3794_v17  ;;  %v3822_v10 = vld [vmem:[%s6350_s3 + $0x2e0] sm:$0xff] }
 0x20f   : > { %2411 = vmatmul.mubr.f32.gmra.mrb[2].mxu1 %v2305_v23  ;;  %v2260_v23 = vmax.f32 %v2257_v15, 0.0  ;;  %v3819_v63 = vld [vmem:[%s6350_s3 + $0x2c8] sm:$0xff]  ;;  %v4520_v15 = vpack.c.bf16 %v3824_v0, %v3822_v10  ;;  %v3826_v18 = vld [vmem:[%s6350_s3 + $0x300] sm:$0xff]  ;;  %v3857_v10 = vld [vmem:[%s6350_s3 + $0x3f8] sm:$0xff] }
 0x210   : > { %4465 = vmatpush1.bf16.msra.mxu1 %v4464_v22  ;;  %2416 = vmatprep.mubr.f32.mxu1 %v5519_v21  ;;  %v3801_v22 = vld [vmem:[%s6350_s3 + $0x238] sm:$0xff]  ;;  %v3823_v6 = vld [vmem:[%s6350_s3 + $0x2e8] sm:$0xff] }
 0x211   : > { %4467 = vmatprep.subr.bf16.mxu1 %v4466_v24  ;;  %v2258_v24 = vmax.f32 %v5489_v55, %v2255_v19  ;;  %v4494_v25 = vpack.c.bf16 %v3801_v22, %v3799_v20  ;;  %v4496_v55 = vpack.c.bf16 %v3800_v27, %v3798_v26  ;;  %v3827_v11 = vld [vmem:[%s6350_s3 + $0x308] sm:$0xff]  ;;  %v3828_v19 = vld [vmem:[%s6350_s3 + $0x310] sm:$0xff] }
 0x212   : > { %v2506_v12 = vld [vmem:[#allocation2 + $0x4] sm:$0xff]  ;;  %v2507_v22 = vld [vmem:[#allocation2 + $0xc] sm:$0xff] }
 0x213   : > { %2417 = vmatmul.mubr.f32.gmra.mrb[4].mxu1 %v2306_v31  ;;  %v3805_v31 = vld [vmem:[%s6350_s3 + $0x258] sm:$0xff]  ;;  %v2509_v13 = vld [vmem:[#allocation2 + $0x5] sm:$0xff] }
 0x214   : > { %4469 = vmatpush1.bf16.msra.mxu1 %v4468_v30  ;;  %2487 = vmatprep.mubr.f32.mxu1 %v5519_v21  ;;  %v2256_v30 = vld [vmem:[#allocation2 + $0x11] sm:$0x7]  ;;  %v4498_v34 = vpack.c.bf16 %v3805_v31, %v3803_v28  ;;  %v3831_v20 = vld [vmem:[%s6350_s3 + $0x328] sm:$0xff]  ;;  %v3830_v28 = vld [vmem:[%s6350_s3 + $0x320] sm:$0xff] }
 0x215   : > { %4471 = vmatprep.subr.bf16.mxu1 %v4470_v32  ;;  %v5645_v32 = vmax.f32 %v2258_v24, 0.0  ;;  %v2259_v33 = vmax.f32 %v2253_v29, %v2256_v30  ;;  %v4524_v24 = vpack.c.bf16 %v3828_v19, %v3826_v18  ;;  %v3832_v29 = vld [vmem:[%s6350_s3 + $0x330] sm:$0xff]  ;;  %v3835_v30 = vld [vmem:[%s6350_s3 + $0x348] sm:$0xff] }
 0x216   : > { %v2508_v31 = vld [vmem:[#allocation2 + $0x14] sm:$0x7] }
 0x218   : > { %4473 = vmatpush1.bf16.msra.mxu1 %v4472_v37  ;;  %v3807_v37 = vld [vmem:[%s6350_s3 + $0x268] sm:$0xff] }
 0x219   : > { %4475 = vmatprep.subr.bf16.mxu1 %v4474_v42  ;;  %v2262_v42 = vmax.f32 %v2259_v33, 0.0  ;;  %v4502_v44 = vpack.c.bf16 %v3809_v38, %v3807_v37  ;;  %v3837_v33 = vld [vmem:[%s6350_s3 + $0x358] sm:$0xff]  ;;  %v3834_v38 = vld [vmem:[%s6350_s3 + $0x340] sm:$0xff] }
 0x21a   : > { %v4530_v37 = vpack.c.bf16 %v3837_v33, %v3835_v30  ;;  %v3867_v33 = vld [vmem:[%s6350_s3 + $0x448] sm:$0xff] }
 0x21c   : > { %4477 = vmatpush1.bf16.msra.mxu1 %v4476_v54  ;;  %v3812_v54 = vld [vmem:[%s6350_s3 + $0x290] sm:$0xff] }
 0x21d   : > { %4479 = vmatprep.subr.bf16.mxu1 %v4478_v58  ;;  %v4508_v58 = vpack.c.bf16 %v3812_v54, %v3810_v53  ;;  %v3845_v53 = vld [vmem:[%s6350_s3 + $0x398] sm:$0xff] }
 0x220   : > { %4481 = vmatpush1.bf16.msra.mxu1 %v4480_v2  ;;  %v4512_v2 = vpack.c.bf16 %v3816_v62, %v3814_v61  ;;  %v3849_v61 = vld [vmem:[%s6350_s3 + $0x3b8] sm:$0xff] }
 0x221   : > { %4483 = vmatprep.subr.bf16.mxu1 %v4482_v3  ;;  %v4514_v3 = vpack.c.bf16 %v3821_v1, %v3819_v63  ;;  %v3846_v1 = vld [vmem:[%s6350_s3 + $0x3a0] sm:$0xff] }
 0x224   : > { %4485 = vmatpush1.bf16.msra.mxu1 %v4484_v8  ;;  %v4516_v8 = vpack.c.bf16 %v3820_v5, %v3818_v4  ;;  %v3853_v4 = vld [vmem:[%s6350_s3 + $0x3d8] sm:$0xff] }
 0x225   : > { %4487 = vmatprep.subr.bf16.mxu1 %v4486_v9  ;;  %v4518_v9 = vpack.c.bf16 %v3825_v7, %v3823_v6  ;;  %v3850_v7 = vld [vmem:[%s6350_s3 + $0x3c0] sm:$0xff] }
 0x228   : > { %4489 = vmatpush1.bf16.msra.mxu1 %v4488_v14  ;;  %v3829_v14 = vld [vmem:[%s6350_s3 + $0x318] sm:$0xff] }
 0x229   : > { %4491 = vmatprep.subr.bf16.mxu1 %v4490_v16  ;;  %v2512_v16 = vmax.f32 %v2506_v12, %v2509_v13  ;;  %v4522_v17 = vpack.c.bf16 %v3829_v14, %v3827_v11  ;;  %v3854_v12 = vld [vmem:[%s6350_s3 + $0x3e0] sm:$0xff]  ;;  %v3856_v13 = vld [vmem:[%s6350_s3 + $0x3f0] sm:$0xff]  ;;  %v3859_v14 = vld [vmem:[%s6350_s3 + $0x408] sm:$0xff] }
 0x22a   : > { %v4552_v18 = vpack.c.bf16 %v3856_v13, %v3854_v12  ;;  %v3889_v12 = vld [vmem:[%s6350_s3 + $0x4f8] sm:$0xff] }
 0x22b   : > { %2488 = vmatmul.mubr.f32.vlgmr.msra.gmra.mrb[0].mxu1 %v2260_v23  ;;  %v3833_v23 = vld [vmem:[%s6350_s3 + $0x338] sm:$0xff] }
 0x22c   : > { %4493 = vmatpush1.bf16.msra.mxu1 %v4492_v50  ;;  %2493 = vmatprep.mubr.f32.mxu1 %v5519_v21  ;;  %v2510_v50 = vld [vmem:[#allocation2 + $0xd] sm:$0xff]  ;;  %v4526_v27 = vpack.c.bf16 %v3833_v23, %v3831_v20 }
 0x22d   : > { %4495 = vmatprep.subr.bf16.mxu1 %v4494_v25  ;;  %v2515_v25 = vmax.f32 %v2512_v16, 0.0  ;;  %v2513_v26 = vmax.f32 %v2507_v22, %v2510_v50  ;;  %v2643_v16 = vld [vmem:[#allocation2 + $0x7] sm:$0xff]  ;;  %v3860_v50 = vld [vmem:[%s6350_s3 + $0x410] sm:$0xff] }
 0x22e   : > { %v3858_v22 = vld [vmem:[%s6350_s3 + $0x400] sm:$0xff]  ;;  %v3863_v23 = vld [vmem:[%s6350_s3 + $0x428] sm:$0xff] }
 0x22f   : > { %2494 = vmatmul.mubr.f32.gmra.mrb[2].mxu1 %v5645_v32  ;;  %v2516_v35 = vmax.f32 %v2513_v26, 0.0  ;;  %v3865_v26 = vld [vmem:[%s6350_s3 + $0x438] sm:$0xff] }
 0x230   : > { %4497 = vmatpush1.bf16.msra.mxu1 %v4496_v55  ;;  %2499 = vmatprep.mubr.f32.mxu1 %v5519_v21  ;;  %v2511_v55 = vld [vmem:[#allocation2 + $0x15] sm:$0x7]  ;;  %v4558_v30 = vpack.c.bf16 %v3865_v26, %v3863_v23  ;;  %v2779_v26 = vld [vmem:[#allocation2 + $0x19] sm:$0x7] }
 0x231   : > { %4499 = vmatprep.subr.bf16.mxu1 %v4498_v34  ;;  %v4528_v34 = vpack.c.bf16 %v3832_v29, %v3830_v28  ;;  %v2514_v36 = vmax.f32 %v2508_v31, %v2511_v55  ;;  %v3862_v31 = vld [vmem:[%s6350_s3 + $0x420] sm:$0xff]  ;;  %v3864_v55 = vld [vmem:[%s6350_s3 + $0x430] sm:$0xff] }
 0x232   : > { %v3892_v23 = vld [vmem:[%s6352_s5 + $0x90] sm:$0xff] }
 0x233   : > { %2500 = vmatmul.mubr.f32.gmra.mrb[4].mxu1 %v2262_v42  ;;  %v3839_v42 = vld [vmem:[%s6350_s3 + $0x368] sm:$0xff]  ;;  %v2517_v47 = vmax.f32 %v2514_v36, 0.0  ;;  %v3869_v36 = vld [vmem:[%s6350_s3 + $0x458] sm:$0xff] }
 0x234   : > { %4501 = vmatpush1.bf16.msra.mxu1 %v4500_v39  ;;  %2615 = vmatprep.mubr.f32.mxu1 %v5519_v21  ;;  %v3836_v39 = vld [vmem:[%s6350_s3 + $0x350] sm:$0xff] }
 0x235   : > { %4503 = vmatprep.subr.bf16.mxu1 %v4502_v44  ;;  %v3841_v44 = vld [vmem:[%s6350_s3 + $0x378] sm:$0xff]  ;;  %v4532_v45 = vpack.c.bf16 %v3836_v39, %v3834_v38 }
 0x236   : > { %v4534_v48 = vpack.c.bf16 %v3841_v44, %v3839_v42  ;;  %v4562_v42 = vpack.c.bf16 %v3869_v36, %v3867_v33  ;;  %v3866_v44 = vld [vmem:[%s6350_s3 + $0x440] sm:$0xff]  ;;  %v3897_v33 = vld [vmem:[%s6352_s5 + $0xb8] sm:$0xff]  ;;  %v3899_v36 = vld [vmem:[%s6352_s5 + $0xc8] sm:$0xff] }
 0x238   : > { %4505 = vmatpush1.bf16.msra.mxu1 %v4504_v51  ;;  %v3840_v51 = vld [vmem:[%s6350_s3 + $0x370] sm:$0xff] }
 0x239   : > { %4507 = vmatprep.subr.bf16.mxu1 %v4506_v52  ;;  %v3843_v52 = vld [vmem:[%s6350_s3 + $0x388] sm:$0xff]  ;;  %v4536_v54 = vpack.c.bf16 %v3840_v51, %v3838_v49 }
 0x23a   : > { %v4538_v56 = vpack.c.bf16 %v3845_v53, %v3843_v52  ;;  %v3870_v53 = vld [vmem:[%s6350_s3 + $0x460] sm:$0xff] }
 0x23c   : > { %4509 = vmatpush1.bf16.msra.mxu1 %v4508_v58  ;;  %v3844_v58 = vld [vmem:[%s6350_s3 + $0x390] sm:$0xff] }
 0x23d   : > { %4511 = vmatprep.subr.bf16.mxu1 %v4510_v59  ;;  %v3847_v59 = vld [vmem:[%s6350_s3 + $0x3a8] sm:$0xff]  ;;  %v4540_v62 = vpack.c.bf16 %v3844_v58, %v3842_v57  ;;  %v3877_v57 = vld [vmem:[%s6350_s3 + $0x498] sm:$0xff] }
 0x23e   : > { %v4542_v63 = vpack.c.bf16 %v3849_v61, %v3847_v59  ;;  %v3874_v61 = vld [vmem:[%s6350_s3 + $0x480] sm:$0xff] }
 0x240   : > { %4513 = vmatpush1.bf16.msra.mxu1 %v4512_v2  ;;  %v3848_v2 = vld [vmem:[%s6350_s3 + $0x3b0] sm:$0xff] }
 0x241   : > { %4515 = vmatprep.subr.bf16.mxu1 %v4514_v3  ;;  %v3851_v3 = vld [vmem:[%s6350_s3 + $0x3c8] sm:$0xff]  ;;  %v4544_v5 = vpack.c.bf16 %v3848_v2, %v3846_v1  ;;  %v3881_v1 = vld [vmem:[%s6350_s3 + $0x4b8] sm:$0xff] }
 0x242   : > { %v4546_v6 = vpack.c.bf16 %v3853_v4, %v3851_v3  ;;  %v3878_v4 = vld [vmem:[%s6350_s3 + $0x4a0] sm:$0xff] }
 0x244   : > { %4517 = vmatpush1.bf16.msra.mxu1 %v4516_v8  ;;  %v3852_v8 = vld [vmem:[%s6350_s3 + $0x3d0] sm:$0xff] }
 0x245   : > { %4519 = vmatprep.subr.bf16.mxu1 %v4518_v9  ;;  %v3855_v9 = vld [vmem:[%s6350_s3 + $0x3e8] sm:$0xff]  ;;  %v4548_v0 = vpack.c.bf16 %v3852_v8, %v3850_v7  ;;  %v3885_v7 = vld [vmem:[%s6350_s3 + $0x4d8] sm:$0xff] }
 0x246   : > { %v4550_v11 = vpack.c.bf16 %v3857_v10, %v3855_v9  ;;  %v3882_v10 = vld [vmem:[%s6350_s3 + $0x4c0] sm:$0xff] }
 0x248   : > { %4521 = vmatpush1.bf16.msra.mxu1 %v4520_v15  ;;  %v2640_v15 = vld [vmem:[#allocation2 + $0x6] sm:$0xff] }
 0x249   : > { %4523 = vmatprep.subr.bf16.mxu1 %v4522_v17  ;;  %v3861_v17 = vld [vmem:[%s6350_s3 + $0x418] sm:$0xff]  ;;  %v2646_v19 = vmax.f32 %v2640_v15, %v2643_v16  ;;  %v3886_v15 = vld [vmem:[%s6350_s3 + $0x4e0] sm:$0xff]  ;;  %v3888_v16 = vld [vmem:[%s6350_s3 + $0x4f0] sm:$0xff] }
 0x24a   : > { %v4554_v20 = vpack.c.bf16 %v3861_v17, %v3859_v14  ;;  %v4584_v17 = vpack.c.bf16 %v3888_v16, %v3886_v15 }
 0x24b   : > { %2616 = vmatmul.mubr.f32.vlgmr.msra.gmra.mrb[0].mxu1 %v2515_v25  ;;  %v2644_v25 = vld [vmem:[#allocation2 + $0xf] sm:$0xff]  ;;  %v2649_v28 = vmax.f32 %v2646_v19, 0.0 }
 0x24c   : > { %4525 = vmatpush1.bf16.msra.mxu1 %v4524_v24  ;;  %2621 = vmatprep.mubr.f32.mxu1 %v5519_v21  ;;  %v2641_v24 = vld [vmem:[#allocation2 + $0xe] sm:$0xff] }
 0x24d   : > { %4527 = vmatprep.subr.bf16.mxu1 %v4526_v27  ;;  %v4556_v27 = vpack.c.bf16 %v3860_v50, %v3858_v22  ;;  %v2647_v29 = vmax.f32 %v2641_v24, %v2644_v25  ;;  %v3891_v19 = vld [vmem:[%s6352_s5 + $0x88] sm:$0xff]  ;;  %v3893_v24 = vld [vmem:[%s6352_s5 + $0x98] sm:$0xff] }
 0x24e   : > { %v2776_v25 = vld [vmem:[#allocation2 + $0x18] sm:$0x7] }
 0x24f   : > { %2622 = vmatmul.mubr.f32.gmra.mrb[2].mxu1 %v2516_v35  ;;  %v2645_v35 = vld [vmem:[#allocation2 + $0x17] sm:$0x7]  ;;  %v2650_v38 = vmax.f32 %v2647_v29, 0.0  ;;  %v3894_v29 = vld [vmem:[%s6352_s5 + $0xa0] sm:$0xff] }
 0x250   : > { %4529 = vmatpush1.bf16.msra.mxu1 %v4528_v34  ;;  %2627 = vmatprep.mubr.f32.mxu1 %v5519_v21  ;;  %v2642_v34 = vld [vmem:[#allocation2 + $0x16] sm:$0x7] }
 0x251   : > { %4531 = vmatprep.subr.bf16.mxu1 %v4530_v37  ;;  %v4560_v37 = vpack.c.bf16 %v3864_v55, %v3862_v31  ;;  %v2648_v39 = vmax.f32 %v2642_v34, %v2645_v35  ;;  %v3896_v55 = vld [vmem:[%s6352_s5 + $0xb0] sm:$0xff]  ;;  %v3898_v35 = vld [vmem:[%s6352_s5 + $0xc0] sm:$0xff] }
 0x252   : > { %v4596_v34 = vpack.c.bf16 %v3897_v33, %v3896_v55  ;;  %v2940_v55 = vld [vmem:[%s6352_s5 + $0x20] sm:$0xff]  ;;  %v2941_v33 = vld [vmem:[%s6352_s5 + $0x28] sm:$0xff] }
 0x253   : > { %2628 = vmatmul.mubr.f32.gmra.mrb[4].mxu1 %v2517_v47  ;;  %v3871_v47 = vld [vmem:[%s6350_s3 + $0x468] sm:$0xff]  ;;  %v2651_v51 = vmax.f32 %v2648_v39, 0.0  ;;  %v3929_v39 = vld [vmem:[%s6352_s5 + $0x1b8] sm:$0xff] }
 0x254   : > { %4533 = vmatpush1.bf16.msra.mxu1 %v4532_v45  ;;  %2749 = vmatprep.mubr.f32.mxu1 %v5519_v21  ;;  %v3868_v45 = vld [vmem:[%s6350_s3 + $0x450] sm:$0xff] }
 0x255   : > { %4535 = vmatprep.subr.bf16.mxu1 %v4534_v48  ;;  %v3873_v48 = vld [vmem:[%s6350_s3 + $0x478] sm:$0xff]  ;;  %v4564_v49 = vpack.c.bf16 %v3868_v45, %v3866_v44  ;;  %v3900_v44 = vld [vmem:[%s6352_s5 + $0xd0] sm:$0xff] }
 0x256   : > { %v4566_v52 = vpack.c.bf16 %v3873_v48, %v3871_v47  ;;  %v3901_v45 = vld [vmem:[%s6352_s5 + $0xd8] sm:$0xff]  ;;  %v3930_v48 = vld [vmem:[%s6352_s5 + $0x1c0] sm:$0xff] }
 0x257   : > { %v4602_v47 = vpack.c.bf16 %v3901_v45, %v3900_v44  ;;  %v2946_v44 = vld [vmem:[%s6352_s5 + $0x50] sm:$0xff]  ;;  %v2947_v45 = vld [vmem:[%s6352_s5 + $0x58] sm:$0xff] }
 0x258   : > { %4537 = vmatpush1.bf16.msra.mxu1 %v4536_v54  ;;  %v3872_v54 = vld [vmem:[%s6350_s3 + $0x470] sm:$0xff] }
 0x259   : > { %4539 = vmatprep.subr.bf16.mxu1 %v4538_v56  ;;  %v3875_v56 = vld [vmem:[%s6350_s3 + $0x488] sm:$0xff]  ;;  %v4568_v58 = vpack.c.bf16 %v3872_v54, %v3870_v53 }
 0x25a   : > { %v4570_v59 = vpack.c.bf16 %v3877_v57, %v3875_v56  ;;  %v3903_v53 = vld [vmem:[%s6352_s5 + $0xe8] sm:$0xff]  ;;  %v3932_v56 = vld [vmem:[%s6352_s5 + $0x1d0] sm:$0xff]  ;;  %v3933_v57 = vld [vmem:[%s6352_s5 + $0x1d8] sm:$0xff] }
 0x25c   : > { %4541 = vmatpush1.bf16.msra.mxu1 %v4540_v62  ;;  %v3876_v62 = vld [vmem:[%s6350_s3 + $0x490] sm:$0xff] }
 0x25d   : > { %4543 = vmatprep.subr.bf16.mxu1 %v4542_v63  ;;  %v3879_v63 = vld [vmem:[%s6350_s3 + $0x4a8] sm:$0xff]  ;;  %v4572_v2 = vpack.c.bf16 %v3876_v62, %v3874_v61  ;;  %v3905_v61 = vld [vmem:[%s6352_s5 + $0xf8] sm:$0xff]  ;;  %v3934_v62 = vld [vmem:[%s6352_s5 + $0x1e0] sm:$0xff] }
 0x25e   : > { %v4574_v3 = vpack.c.bf16 %v3881_v1, %v3879_v63  ;;  %v3935_v1 = vld [vmem:[%s6352_s5 + $0x1e8] sm:$0xff] }
 0x260   : > { %4545 = vmatpush1.bf16.msra.mxu1 %v4544_v5  ;;  %v3880_v5 = vld [vmem:[%s6350_s3 + $0x4b0] sm:$0xff] }
 0x261   : > { %4547 = vmatprep.subr.bf16.mxu1 %v4546_v6  ;;  %v3883_v6 = vld [vmem:[%s6350_s3 + $0x4c8] sm:$0xff]  ;;  %v4576_v8 = vpack.c.bf16 %v3880_v5, %v3878_v4  ;;  %v3937_v4 = vld [vmem:[%s6352_s5 + $0x1f8] sm:$0xff] }
 0x262   : > { %v4578_v9 = vpack.c.bf16 %v3885_v7, %v3883_v6  ;;  %v2908_v6 = vld [vmem:[%s6351_s4] sm:$0x3] }
 0x263   : > { %v2913_v7 = vrot.slane %v2908_v6, %v2227_v41 }
 0x264   : > { %4549 = vmatpush1.bf16.msra.mxu1 %v4548_v0  ;;  %v3884_v0 = vld [vmem:[%s6350_s3 + $0x4d0] sm:$0xff] }
 0x265   : > { %4551 = vmatprep.subr.bf16.mxu1 %v4550_v11  ;;  %v3887_v11 = vld [vmem:[%s6350_s3 + $0x4e8] sm:$0xff]  ;;  %v4580_v13 = vpack.c.bf16 %v3884_v0, %v3882_v10 }
 0x266   : > { %v4582_v14 = vpack.c.bf16 %v3889_v12, %v3887_v11 }
 0x268   : > { %4553 = vmatpush1.bf16.msra.mxu1 %v4552_v18  ;;  %v3890_v18 = vld [vmem:[%s6352_s5 + $0x80] sm:$0xff] }
 0x269   : > { %4555 = vmatprep.subr.bf16.mxu1 %v4554_v20  ;;  %v2778_v20 = vld [vmem:[#allocation2 + $0x11] sm:$0xff]  ;;  %v4587_v22 = vpack.c.bf16 %v3891_v19, %v3890_v18 }
 0x26a   : > { %v2781_v50 = vmax.f32 %v5492_v60, %v2778_v20  ;;  %v2782_v60 = vmax.f32 %v2776_v25, %v2779_v26 }
 0x26b   : > { %2750 = vmatmul.mubr.f32.vlgmr.msra.gmra.mrb[0].mxu1 %v2649_v28 }
 0x26c   : > { %4557 = vmatpush1.bf16.msra.mxu1 %v4556_v27  ;;  %2755 = vmatprep.mubr.f32.mxu1 %v5519_v21  ;;  %v4590_v27 = vpack.c.bf16 %v3893_v24, %v3892_v23  ;;  %v2784_v28 = vmax.f32 %v2781_v50, 0.0  ;;  %v2785_v31 = vmax.f32 %v2782_v60, 0.0 }
 0x26d   : > { %4559 = vmatprep.subr.bf16.mxu1 %v4558_v30  ;;  %v3895_v30 = vld [vmem:[%s6352_s5 + $0xa8] sm:$0xff] }
 0x26f   : > { %2756 = vmatmul.mubr.f32.gmra.mrb[2].mxu1 %v2650_v38  ;;  %v3928_v38 = vld [vmem:[%s6352_s5 + $0x1b0] sm:$0xff] }
 0x270   : > { %4561 = vmatpush1.bf16.msra.mxu1 %v4560_v37  ;;  %2761 = vmatprep.mubr.f32.mxu1 %v5519_v21  ;;  %v4599_v37 = vpack.c.bf16 %v3899_v36, %v3898_v35  ;;  %v2942_v35 = vld [vmem:[%s6352_s5 + $0x30] sm:$0xff]  ;;  %v2943_v36 = vld [vmem:[%s6352_s5 + $0x38] sm:$0xff] }
 0x271   : > { %4563 = vmatprep.subr.bf16.mxu1 %v4562_v42  ;;  %v4668_v42 = vpack.c.bf16 %v3929_v39, %v3928_v38  ;;  %v2944_v38 = vld [vmem:[%s6352_s5 + $0x40] sm:$0xff]  ;;  %v2945_v39 = vld [vmem:[%s6352_s5 + $0x48] sm:$0xff] }
 0x273   : > { %2762 = vmatmul.mubr.f32.gmra.mrb[4].mxu1 %v2651_v51  ;;  %4669 = vmatpush3.bf16.msra.mxu0 %v4668_v42  ;;  %v4623_v42 = vpack.c.bf16 %v2945_v39, %v2944_v38  ;;  %v3950_v38 = vld [vmem:[%s6352_s5 + $0x260] sm:$0xff]  ;;  %v3951_v39 = vld [vmem:[%s6352_s5 + $0x268] sm:$0xff] }
 0x274   : > { %4565 = vmatpush1.bf16.msra.mxu1 %v4564_v49  ;;  %2883 = vmatprep.mubr.f32.mxu1 %v5519_v21  ;;  %v3931_v49 = vld [vmem:[%s6352_s5 + $0x1c8] sm:$0xff] }
 0x275   : > { %4567 = vmatprep.subr.bf16.mxu1 %v4566_v52  ;;  %4670 = vmatprep.subr.bf16.mxu0 %v5036_v46  ;;  %v4671_v51 = vpack.c.bf16 %v3931_v49, %v3930_v48  ;;  %v3902_v52 = vld [vmem:[%s6352_s5 + $0xe0] sm:$0xff]  ;;  %v2949_v49 = vld [vmem:[%s6352_s5 + $0x68] sm:$0xff] }
 0x276   : > { %v4605_v54 = vpack.c.bf16 %v3903_v53, %v3902_v52  ;;  %v2948_v48 = vld [vmem:[%s6352_s5 + $0x60] sm:$0xff]  ;;  %v2950_v52 = vld [vmem:[%s6352_s5 + $0x70] sm:$0xff]  ;;  %v2951_v53 = vld [vmem:[%s6352_s5 + $0x78] sm:$0xff] }
 0x277   : > { %4672 = vmatpush3.bf16.msra.mxu0 %v4671_v51  ;;  %v4629_v51 = vpack.c.bf16 %v2949_v49, %v2948_v48 }
 0x278   : > { %4569 = vmatpush1.bf16.msra.mxu1 %v4568_v58  ;;  %4673 = vmatprep.subr.bf16.mxu0 %v5036_v46  ;;  %v4674_v58 = vpack.c.bf16 %v3933_v57, %v3932_v56  ;;  %v4632_v57 = vpack.c.bf16 %v2951_v53, %v2950_v52  ;;  %v3392_v53 = vld [vmem:[%s6354_s7] sm:$0xff] }
 0x279   : > { %4571 = vmatprep.subr.bf16.mxu1 %v4570_v59  ;;  %v3904_v59 = vld [vmem:[%s6352_s5 + $0xf0] sm:$0xff] }
 0x27a   : > { %v4608_v63 = vpack.c.bf16 %v3905_v61, %v3904_v59  ;;  %v3906_v59 = vld [vmem:[%s6352_s5 + $0x100] sm:$0xff]  ;;  %v3907_v61 = vld [vmem:[%s6352_s5 + $0x108] sm:$0xff] }
 0x27b   : > { %4675 = vmatpush3.bf16.msra.mxu0 %v4674_v58 }
 0x27c   : > { %4573 = vmatpush1.bf16.msra.mxu1 %v4572_v2  ;;  %4676 = vmatprep.subr.bf16.mxu0 %v5036_v46  ;;  %v4677_v2 = vpack.c.bf16 %v3935_v1, %v3934_v62  ;;  %v4635_v62 = vpack.c.bf16 %v3907_v61, %v3906_v59  ;;  %v3908_v1 = vld [vmem:[%s6352_s5 + $0x110] sm:$0xff]  ;;  %v3396_v61 = vld [vmem:[%s6354_s7 + $0x20] sm:$0xff] }
 0x27d   : > { %4575 = vmatprep.subr.bf16.mxu1 %v4574_v3  ;;  %v3936_v3 = vld [vmem:[%s6352_s5 + $0x1f0] sm:$0xff] }
 0x27e   : > { %v4680_v5 = vpack.c.bf16 %v3937_v4, %v3936_v3  ;;  %v3910_v4 = vld [vmem:[%s6352_s5 + $0x120] sm:$0xff] }
 0x27f   : > { %4678 = vmatpush3.bf16.msra.mxu0 %v4677_v2  ;;  %v3909_v2 = vld [vmem:[%s6352_s5 + $0x118] sm:$0xff] }
 0x280   : > { %4577 = vmatpush1.bf16.msra.mxu1 %v4576_v8  ;;  %4679 = vmatprep.subr.bf16.mxu0 %v5036_v46  ;;  %v2917_v8 = vrot.slane %v2908_v6, %v2231_v43  ;;  %v2937_v43 = vld [vmem:[%s6352_s5 + $0x8] sm:$0xff]  ;;  %v4638_v3 = vpack.c.bf16 %v3909_v2, %v3908_v1  ;;  %v3398_v1 = vld [vmem:[%s6354_s7 + $0x30] sm:$0xff]  ;;  %v3399_v2 = vld [vmem:[%s6354_s7 + $0x38] sm:$0xff] }
 0x281   : > { %4579 = vmatprep.subr.bf16.mxu1 %v4578_v9  ;;  %v4611_v25 = vpack.c.bf16 %v2937_v43, %v2936_v40  ;;  %v3938_v40 = vld [vmem:[%s6352_s5 + $0x200] sm:$0xff]  ;;  %v3939_v43 = vld [vmem:[%s6352_s5 + $0x208] sm:$0xff] }
 0x283   : > { %4681 = vmatpush3.bf16.msra.mxu0 %v4680_v5  ;;  %v3911_v5 = vld [vmem:[%s6352_s5 + $0x128] sm:$0xff] }
 0x284   : > { %4581 = vmatpush1.bf16.msra.mxu1 %v4580_v13  ;;  %4706 = vmatprep.subr.bf16.mxu0 %v5036_v46  ;;  %v4641_v6 = vpack.c.bf16 %v3911_v5, %v3910_v4  ;;  %v3400_v4 = vld [vmem:[%s6354_s7 + $0x40] sm:$0xff]  ;;  %v3401_v5 = vld [vmem:[%s6354_s7 + $0x48] sm:$0xff] }
 0x285   : > { %4583 = vmatprep.subr.bf16.mxu1 %v4582_v14 }
 0x288   : > { %4585 = vmatpush1.bf16.msra.mxu1 %v4584_v17 }
 0x289   : > { %4586 = vmatprep.subr.bf16.mxu1 %v5036_v46 }
 0x28b   : > { %2884 = vmatmul.mubr.f32.vlgmr.msra.gmra.mrb[0].mxu1 %v5645_v32  ;;  %v4593_v32 = vpack.c.bf16 %v3895_v30, %v3894_v29 }
 0x28c   : > { %2889 = vmatprep.mubr.f32.mxu1 %v5519_v21  ;;  %4588 = vmatpush3.bf16.msra.mxu1 %v4587_v22 }
 0x28d   : > { %4589 = vmatprep.subr.bf16.mxu1 %v5036_v46 }
 0x28f   : > { %2890 = vmatmul.mubr.f32.gmra.mrb[2].mxu1 %v2784_v28  ;;  %v2939_v28 = vld [vmem:[%s6352_s5 + $0x18] sm:$0xff] }
 0x290   : > { %2895 = vmatprep.mubr.f32.mxu1 %v5519_v21  ;;  %4591 = vmatpush3.bf16.msra.mxu1 %v4590_v27  ;;  %v2938_v27 = vld [vmem:[%s6352_s5 + $0x10] sm:$0xff] }
 0x291   : > { %4592 = vmatprep.subr.bf16.mxu1 %v5036_v46 }
 0x293   : > { %2896 = vmatmul.mubr.f32.gmra.mrb[4].mxu1 %v2785_v31 }
 0x294   : > { %4594 = vmatpush3.bf16.msra.mxu1 %v4593_v32  ;;  %4105 = vmatprep.mubr.msk.f32.mxu1 %vm5037_vm1, %v5519_v21  ;;  %v4614_v32 = vpack.c.bf16 %v2939_v28, %v2938_v27  ;;  %v6151_v27 = vld [vmem:[#allocation3 + $0x18] sm:$0xff]  ;;  %v3942_v28 = vld [vmem:[%s6352_s5 + $0x220] sm:$0xff] }
 0x295   : > { %4595 = vmatprep.subr.bf16.mxu1 %v5036_v46 }
 0x298   : > { %4597 = vmatpush3.bf16.msra.mxu1 %v4596_v34  ;;  %v4617_v34 = vpack.c.bf16 %v2941_v33, %v2940_v55  ;;  %v3946_v55 = vld [vmem:[%s6352_s5 + $0x240] sm:$0xff]  ;;  %v3947_v33 = vld [vmem:[%s6352_s5 + $0x248] sm:$0xff] }
 0x299   : > { %4598 = vmatprep.subr.bf16.mxu1 %v5036_v46 }
 0x29c   : > { %4600 = vmatpush3.bf16.msra.mxu1 %v4599_v37  ;;  %v4620_v37 = vpack.c.bf16 %v2943_v36, %v2942_v35  ;;  %v3948_v35 = vld [vmem:[%s6352_s5 + $0x250] sm:$0xff]  ;;  %v3949_v36 = vld [vmem:[%s6352_s5 + $0x258] sm:$0xff] }
 0x29d   : > { %4601 = vmatprep.subr.bf16.mxu1 %v5036_v46 }
 0x2a0   : > { %4603 = vmatpush3.bf16.msra.mxu1 %v4602_v47  ;;  %v4626_v47 = vpack.c.bf16 %v2947_v45, %v2946_v44  ;;  %v3952_v44 = vld [vmem:[%s6352_s5 + $0x270] sm:$0xff]  ;;  %v3953_v45 = vld [vmem:[%s6352_s5 + $0x278] sm:$0xff] }
 0x2a1   : > { %4604 = vmatprep.subr.bf16.mxu1 %v5036_v46  ;;  %v4704_v49 = vpack.c.bf16 %v3953_v45, %v3952_v44 }
 0x2a4   : > { %4606 = vmatpush3.bf16.msra.mxu1 %v4605_v54 }
 0x2a5   : > { %4607 = vmatprep.subr.bf16.mxu1 %v5036_v46 }
 0x2a8   : > { %4609 = vmatpush3.bf16.msra.mxu1 %v4608_v63 }
 0x2a9   : > { %4610 = vmatprep.subr.bf16.mxu1 %v5036_v46 }
 0x35e   : > { %v2885_v9 = vpop.f32.mrb[0].mxu1 }
 0x35f   : > { %v2920_v10 = vadd.f32 %v2913_v7, %v2885_v9  ;;  %v2887_v0 = vpop.f32.mrb[1].mxu1  ;;  %v3914_v9 = vld [vmem:[%s6352_s5 + $0x140] sm:$0xff] }
 0x360   : > { %v2921_v11 = vadd.f32 %v2917_v8, %v2887_v0 }
 0x362   : > { %v2926_v12 = vmax.f32 %v2920_v10, %v2921_v11  ;;  %v2891_v13 = vpop.f32.mrb[2].mxu1  ;;  %v3915_v10 = vld [vmem:[%s6352_s5 + $0x148] sm:$0xff]  ;;  %v3916_v11 = vld [vmem:[%s6352_s5 + $0x150] sm:$0xff] }
 0x363   : > { %v2922_v14 = vadd.f32 %v2913_v7, %v2891_v13  ;;  %v2893_v15 = vpop.f32.mrb[3].mxu1  ;;  %v4647_v0 = vpack.c.bf16 %v3915_v10, %v3914_v9  ;;  %v3404_v9 = vld [vmem:[%s6354_s7 + $0x60] sm:$0xff]  ;;  %v3405_v10 = vld [vmem:[%s6354_s7 + $0x68] sm:$0xff] }
 0x364   : > { %2929 = vst [vmem:[#allocation3] sm:$0xff] %v2926_v12  ;;  %v2923_v16 = vadd.f32 %v2917_v8, %v2893_v15  ;;  %v3917_v12 = vld [vmem:[%s6352_s5 + $0x158] sm:$0xff]  ;;  %v3919_v15 = vld [vmem:[%s6352_s5 + $0x168] sm:$0xff] }
 0x365   : > { %v4650_v13 = vpack.c.bf16 %v3917_v12, %v3916_v11  ;;  %v3406_v11 = vld [vmem:[%s6354_s7 + $0x70] sm:$0xff]  ;;  %v3483_v12 = vld [vmem:[%s6356_s9] sm:$0xff] }
 0x366   : > { %v2927_v17 = vmax.f32 %v2922_v14, %v2923_v16  ;;  %v2897_v18 = vpop.f32.mrb[4].mxu1  ;;  %v3918_v14 = vld [vmem:[%s6352_s5 + $0x160] sm:$0xff] }
 0x367   : > { %v2924_v19 = vadd.f32 %v2913_v7, %v2897_v18  ;;  %v2899_v20 = vpop.f32.mrb[5].mxu1  ;;  %v3912_v7 = vld [vmem:[%s6352_s5 + $0x130] sm:$0xff]  ;;  %v4653_v16 = vpack.c.bf16 %v3919_v15, %v3918_v14  ;;  %v3921_v18 = vld [vmem:[%s6352_s5 + $0x178] sm:$0xff] }
 0x368   : > { %2930 = vst [vmem:[#allocation3 + $0x8] sm:$0xff] %v2927_v17  ;;  %v2925_v22 = vadd.f32 %v2917_v8, %v2899_v20  ;;  %v3920_v17 = vld [vmem:[%s6352_s5 + $0x170] sm:$0xff] }
 0x369   : > { %v3485_v14 = vld [vmem:[%s6356_s9 + $0x10] sm:$0xff] }
 0x36a   : > { %v2928_v41 = vmax.f32 %v2924_v19, %v2925_v22  ;;  %v4656_v22 = vpack.c.bf16 %v3921_v18, %v3920_v17  ;;  %v3487_v18 = vld [vmem:[%s6356_s9 + $0x20] sm:$0xff] }
 0x36b   : > { %v2952_v50 = vld [vmem:[#allocation3 + $0x4] sm:$0x1]  ;;  %v2953_v23 = vld [vmem:[#allocation3 + $0x6] sm:$0x1]  ;;  %v2932_v54 = vld [vmem:[#allocation3] sm:$0x1] }
 0x36c   : > { %2931 = vst [vmem:[#allocation3 + $0x10] sm:$0x7] %v2928_v41  ;;  %v2954_v24 = vmax.f32 %v2952_v50, %v2953_v23  ;;  %v2933_v56 = vld [vmem:[#allocation3 + $0x2] sm:$0x1]  ;;  %v4683_v50 = vpack.c.bf16 %v3939_v43, %v3938_v40 }
 0x36d   : > { %v2934_v58 = vmax.f32 %v2932_v54, %v2933_v56  ;;  %v3393_v54 = vld [vmem:[%s6354_s7 + $0x8] sm:$0xff]  ;;  %v3394_v56 = vld [vmem:[%s6354_s7 + $0x10] sm:$0xff] }
 0x36e   : > { %v2955_v26 = vmax.f32 %v2954_v24, 0.0  ;;  %v3940_v24 = vld [vmem:[%s6352_s5 + $0x210] sm:$0xff] }
 0x36f   : > { %v3205_v60 = vld [vmem:[#allocation3 + $0xc] sm:$0x1]  ;;  %v3206_v29 = vld [vmem:[#allocation3 + $0xe] sm:$0x1]  ;;  %v2935_v63 = vmax.f32 %v2934_v58, 0.0  ;;  %v3395_v58 = vld [vmem:[%s6354_s7 + $0x18] sm:$0xff] }
 0x370   : > { %4106 = vmatmul.mubr.f32.vlgmr.msra.gmra.mrb[6].mxu1 %v2955_v26  ;;  %v3207_v30 = vmax.f32 %v3205_v60, %v3206_v29  ;;  %v3113_v19 = vld [vmem:[#allocation3 + $0x8] sm:$0x1]  ;;  %v3114_v20 = vld [vmem:[#allocation3 + $0xa] sm:$0x1]  ;;  %v4710_v59 = vpack.c.bf16 %v3395_v58, %v3394_v56 }
 0x371   : > { %4612 = vmatpush3.bf16.msra.mxu1 %v4611_v25  ;;  %4140 = vmatprep.mubr.msk.f32.mxu1 %vm5037_vm1, %v5519_v21  ;;  %v3115_v41 = vmax.f32 %v3113_v19, %v3114_v20  ;;  %v3941_v25 = vld [vmem:[%s6352_s5 + $0x218] sm:$0xff]  ;;  %v3943_v60 = vld [vmem:[%s6352_s5 + $0x228] sm:$0xff] }
 0x372   : > { %4613 = vmatprep.subr.bf16.mxu1 %v5036_v46  ;;  %v3208_v31 = vmax.f32 %v3207_v30, 0.0  ;;  %v4686_v26 = vpack.c.bf16 %v3941_v25, %v3940_v24  ;;  %v4689_v29 = vpack.c.bf16 %v3943_v60, %v3942_v28  ;;  %v3944_v30 = vld [vmem:[%s6352_s5 + $0x230] sm:$0xff]  ;;  %v3488_v19 = vld [vmem:[%s6356_s9 + $0x28] sm:$0xff] }
 0x373   : > { %v3116_v23 = vmax.f32 %v3115_v41, 0.0  ;;  %v3298_v48 = vld [vmem:[#allocation3 + $0x12] sm:$0x1]  ;;  %v4734_v20 = vpack.c.bf16 %v3488_v19, %v3487_v18  ;;  %v3490_v41 = vld [vmem:[%s6356_s9 + $0x38] sm:$0xff] }
 0x374   : > { %4211 = vmatmul.mubr.f32.vlgmr.msra.gmra.mrb[8].mxu0 %v3208_v31 }
 0x375   : > { %4615 = vmatpush3.bf16.msra.mxu1 %v4614_v32  ;;  %4278 = vmatprep.mubr.msk.f32.mxu0 %vm5037_vm1, %v5519_v21  ;;  %v3945_v32 = vld [vmem:[%s6352_s5 + $0x238] sm:$0xff] }
 0x376   : > { %4616 = vmatprep.subr.bf16.mxu1 %v5036_v46  ;;  %v4692_v31 = vpack.c.bf16 %v3945_v32, %v3944_v30 }
 0x379   : > { %4618 = vmatpush3.bf16.msra.mxu1 %v4617_v34  ;;  %v4695_v34 = vpack.c.bf16 %v3947_v33, %v3946_v55  ;;  %v3389_v55 = vld [vmem:[%s6353_s6] sm:$0x1] }
 0x37a   : > { %4619 = vmatprep.subr.bf16.mxu1 %v5036_v46 }
 0x37d   : > { %4621 = vmatpush3.bf16.msra.mxu1 %v4620_v37  ;;  %v4698_v37 = vpack.c.bf16 %v3949_v36, %v3948_v35  ;;  %v3491_v36 = vld [vmem:[%s6356_s9 + $0x40] sm:$0xff] }
 0x37e   : > { %4622 = vmatprep.subr.bf16.mxu1 %v5036_v46 }
 0x381   : > { %4624 = vmatpush3.bf16.msra.mxu1 %v4623_v42  ;;  %v4701_v42 = vpack.c.bf16 %v3951_v39, %v3950_v38  ;;  %v3493_v39 = vld [vmem:[%s6356_s9 + $0x50] sm:$0xf] }
 0x382   : > { %4625 = vmatprep.subr.bf16.mxu1 %v5036_v46 }
 0x385   : > { %4627 = vmatpush3.bf16.msra.mxu1 %v4626_v47  ;;  %v3297_v47 = vld [vmem:[#allocation3 + $0x10] sm:$0x1] }
 0x386   : > { %4628 = vmatprep.subr.bf16.mxu1 %v5036_v46 }
 0x389   : > { %4630 = vmatpush3.bf16.msra.mxu1 %v4629_v51  ;;  %v3299_v51 = vmax.f32 %v3297_v47, %v3298_v48 }
 0x38a   : > { %4631 = vmatprep.subr.bf16.mxu1 %v5036_v46 }
 0x38b   : > { %v3300_v52 = vmax.f32 %v3299_v51, 0.0 }
 0x38d   : > { %4633 = vmatpush3.bf16.msra.mxu1 %v4632_v57  ;;  %v4707_v57 = vpack.c.bf16 %v3393_v54, %v3392_v53 }
 0x38e   : > { %4634 = vmatprep.subr.bf16.mxu1 %v5036_v46 }
 0x38f   : > { %4708 = vmatpush3.bf16.msra.mxu0 %v4707_v57 }
 0x390   : > { %4141 = vmatmul.mubr.f32.vlgmr.msra.gmra.mrb[8].mxu1 %v2935_v63  ;;  %4709 = vmatprep.subr.bf16.mxu0 %v5036_v46 }
 0x391   : > { %4636 = vmatpush3.bf16.msra.mxu1 %v4635_v62  ;;  %4175 = vmatprep.mubr.msk.f32.mxu1 %vm5037_vm1, %v5519_v21  ;;  %v3913_v21 = vld [vmem:[%s6352_s5 + $0x138] sm:$0xff]  ;;  %v3397_v62 = vld [vmem:[%s6354_s7 + $0x28] sm:$0xff] }
 0x392   : > { %4637 = vmatprep.subr.bf16.mxu1 %v5036_v46  ;;  %v4644_v8 = vpack.c.bf16 %v3913_v21, %v3912_v7  ;;  %v4713_v63 = vpack.c.bf16 %v3397_v62, %v3396_v61  ;;  %v3402_v7 = vld [vmem:[%s6354_s7 + $0x50] sm:$0xff]  ;;  %v3403_v21 = vld [vmem:[%s6354_s7 + $0x58] sm:$0xff] }
 0x393   : > { %4711 = vmatpush3.bf16.msra.mxu0 %v4710_v59 }
 0x394   : > { %4712 = vmatprep.subr.bf16.mxu0 %v5036_v46 }
 0x395   : > { %4639 = vmatpush3.bf16.msra.mxu1 %v4638_v3  ;;  %v4716_v3 = vpack.c.bf16 %v3399_v2, %v3398_v1 }
 0x396   : > { %4640 = vmatprep.subr.bf16.mxu1 %v5036_v46 }
 0x397   : > { %4714 = vmatpush3.bf16.msra.mxu0 %v4713_v63 }
 0x398   : > { %4715 = vmatprep.subr.bf16.mxu0 %v5036_v46 }
 0x399   : > { %4642 = vmatpush3.bf16.msra.mxu1 %v4641_v6  ;;  %v4719_v6 = vpack.c.bf16 %v3401_v5, %v3400_v4 }
 0x39a   : > { %4643 = vmatprep.subr.bf16.mxu1 %v5036_v46 }
 0x39b   : > { %4717 = vmatpush3.bf16.msra.mxu0 %v4716_v3 }
 0x39c   : > { %4718 = vmatprep.subr.bf16.mxu0 %v5036_v46 }
 0x39d   : > { %4645 = vmatpush3.bf16.msra.mxu1 %v4644_v8  ;;  %v4722_v8 = vpack.c.bf16 %v3403_v21, %v3402_v7 }
 0x39e   : > { %4646 = vmatprep.subr.bf16.mxu1 %v5036_v46 }
 0x39f   : > { %4720 = vmatpush3.bf16.msra.mxu0 %v4719_v6 }
 0x3a0   : > { %4721 = vmatprep.subr.bf16.mxu0 %v5036_v46 }
 0x3a1   : > { %4648 = vmatpush3.bf16.msra.mxu1 %v4647_v0  ;;  %v4725_v0 = vpack.c.bf16 %v3405_v10, %v3404_v9 }
 0x3a2   : > { %4649 = vmatprep.subr.bf16.mxu1 %v5036_v46 }
 0x3a3   : > { %4723 = vmatpush3.bf16.msra.mxu0 %v4722_v8 }
 0x3a4   : > { %4724 = vmatprep.subr.bf16.mxu0 %v5036_v46 }
 0x3a5   : > { %4651 = vmatpush3.bf16.msra.mxu1 %v4650_v13  ;;  %v3484_v13 = vld [vmem:[%s6356_s9 + $0x8] sm:$0xff] }
 0x3a6   : > { %4652 = vmatprep.subr.bf16.mxu1 %v5036_v46  ;;  %v4728_v15 = vpack.c.bf16 %v3484_v13, %v3483_v12 }
 0x3a7   : > { %4726 = vmatpush3.bf16.msra.mxu0 %v4725_v0 }
 0x3a8   : > { %4276 = vmatprep.subr.mxu0 %v6151_v27 }
 0x3a9   : > { %4654 = vmatpush3.bf16.msra.mxu1 %v4653_v16  ;;  %v3486_v16 = vld [vmem:[%s6356_s9 + $0x18] sm:$0xff] }
 0x3aa   : > { %4655 = vmatprep.subr.bf16.mxu1 %v5036_v46  ;;  %v4731_v17 = vpack.c.bf16 %v3486_v16, %v3485_v14 }
 0x3ab   : > { %4277 = vmatpush3.msra.mxu0 %v3406_v11 }
 0x3ad   : > { %4657 = vmatpush3.bf16.msra.mxu1 %v4656_v22  ;;  %v3489_v22 = vld [vmem:[%s6356_s9 + $0x30] sm:$0xff] }
 0x3ae   : > { %4682 = vmatprep.subr.bf16.mxu1 %v5036_v46  ;;  %v4737_v40 = vpack.c.bf16 %v3490_v41, %v3489_v22 }
 0x3b0   : > { %4176 = vmatmul.mubr.f32.vlgmr.msra.gmra.mrb[10].mxu1 %v3116_v23 }
 0x3b1   : > { %4684 = vmatpush3.bf16.msra.mxu1 %v4683_v50  ;;  %4245 = vmatprep.mubr.msk.f32.mxu1 %vm5037_vm1, %v6151_v27 }
 0x3b2   : > { %4685 = vmatprep.subr.bf16.mxu1 %v5036_v46 }
 0x3b5   : > { %4687 = vmatpush3.bf16.msra.mxu1 %v4686_v26 }
 0x3b6   : > { %4688 = vmatprep.subr.bf16.mxu1 %v5036_v46 }
 0x3b9   : > { %4690 = vmatpush3.bf16.msra.mxu1 %v4689_v29 }
 0x3ba   : > { %4691 = vmatprep.subr.bf16.mxu1 %v5036_v46 }
 0x3bd   : > { %4693 = vmatpush3.bf16.msra.mxu1 %v4692_v31 }
 0x3be   : > { %4694 = vmatprep.subr.bf16.mxu1 %v5036_v46 }
 0x3c1   : > { %4696 = vmatpush3.bf16.msra.mxu1 %v4695_v34 }
 0x3c2   : > { %4697 = vmatprep.subr.bf16.mxu1 %v5036_v46 }
 0x3c5   : > { %4699 = vmatpush3.bf16.msra.mxu1 %v4698_v37  ;;  %v3492_v37 = vld [vmem:[%s6356_s9 + $0x48] sm:$0xff] }
 0x3c6   : > { %4700 = vmatprep.subr.bf16.mxu1 %v5036_v46  ;;  %v4740_v38 = vpack.c.bf16 %v3492_v37, %v3491_v36 }
 0x3c9   : > { %4702 = vmatpush3.bf16.msra.mxu1 %v4701_v42  ;;  %v3407_v42 = vld [vmem:[%s6355_s8] sm:$0x1] }
 0x3ca   : > { %4703 = vmatprep.subr.bf16.mxu1 %v5036_v46 }
 0x3cd   : > { %4705 = vmatpush3.bf16.msra.mxu1 %v4704_v49 }
 0x3ce   : > { %4727 = vmatprep.subr.bf16.mxu1 %v5036_v46 }
 0x3d0   : > { %4246 = vmatmul.mubr.f32.vlgmr.msra.gmra.mrb[12].mxu1 %v3300_v52 }
 0x3d1   : > { %4303 = vmatprep.mubr.msk.f32.mxu1 %vm5037_vm1, %v6151_v27  ;;  %4729 = vmatpush3.bf16.msra.mxu1 %v4728_v15 }
 0x3d2   : > { %4730 = vmatprep.subr.bf16.mxu1 %v5036_v46 }
 0x3d5   : > { %4732 = vmatpush3.bf16.msra.mxu1 %v4731_v17 }
 0x3d6   : > { %4733 = vmatprep.subr.bf16.mxu1 %v5036_v46 }
 0x3d9   : > { %4735 = vmatpush3.bf16.msra.mxu1 %v4734_v20 }
 0x3da   : > { %4736 = vmatprep.subr.bf16.mxu1 %v5036_v46 }
 0x3dd   : > { %4738 = vmatpush3.bf16.msra.mxu1 %v4737_v40 }
 0x3de   : > { %4739 = vmatprep.subr.bf16.mxu1 %v5036_v46 }
 0x3e1   : > { %4741 = vmatpush3.bf16.msra.mxu1 %v4740_v38 }
 0x3e2   : > { %4301 = vmatprep.subr.mxu1 %v6151_v27  ;;  %v3494_v27 = vld [vmem:[%s6357_s10] sm:$0x1] }
 0x3e5   : > { %4302 = vmatpush3.msk.msra.mxu1 %vm3499_vm3, %v3493_v39 }
 0x443   : > { %v3039_v43 = vpop.f32.mrb[6].mxu1 }
 0x444   : > { %v4107_v50 = vpop.f32.mrb[7].mxu1 }
 0x447   : > { %v3292_v23 = vpop.f32.mrb[8].mxu0 }
 0x448   : > { %v4212_v24 = vpop.f32.mrb[9].mxu0 }
 0x463   : > { %v3109_v25 = vpop.f32.mrb[8].mxu1 }
 0x464   : > { %v3110_v26 = vadd.f32 %v3109_v25, %v3039_v43  ;;  %v4142_v28 = vpop.f32.mrb[9].mxu1 }
 0x483   : > { %v3200_v60 = vpop.f32.mrb[10].mxu1 }
 0x484   : > { %v3204_v29 = vadd.f32 %v3200_v60, %v3110_v26  ;;  %v4177_v30 = vpop.f32.mrb[11].mxu1 }
 0x486   : > { %v3296_v32 = vadd.f32 %v3292_v23, %v3204_v29 }
 0x4a3   : > { %v3384_v31 = vpop.f32.mrb[12].mxu1 }
 0x4a4   : > { %v3388_v33 = vadd.f32 %v3384_v31, %v3296_v32  ;;  %v4247_v34 = vpop.f32.mrb[13].mxu1 }
 0x4a6   : > { %v3390_v35 = vadd.f32 %v3389_v55, %v3388_v33 }
 0x4a8   : > { %v3391_v46 = vmax.f32 %v3390_v35, 0.0 }
 0x4aa   : > { %4279 = vmatmul.mubr.msk.f32.vlgmr.msra.gmra.mrb[10].mxu0 %vm3408_vm2, %v3391_v46 }
 0x57d   : > { %v3478_v44 = vpop.f32.mrb[10].mxu0 }
 0x57e   : > { %v3479_v45 = vadd.f32 %v3478_v44, %v3407_v42  ;;  %v4280_v47 = vpop.f32.mrb[11].mxu0 }
 0x580   : > { %v3482_v48 = vmax.f32 %v3479_v45, 0.0 }
 0x582   : > { %4304 = vmatmul.mubr.msk.f32.vlgmr.msra.gmra.mrb[14].mxu1 %vm3495_vm4, %v3482_v48 }
 0x655   : > { %v3569_v49 = vpop.f32.mrb[14].mxu1 }
 0x656   : > { %v3570_v51 = vadd.f32 %v3569_v49, %v3494_v27  ;;  %v4305_v52 = vpop.f32.mrb[15].mxu1 }
 0x658   : > { %3574 = vst.msk [vmem:[%s393_s29] sm:$0x1] %vm3573_vm5, %v3570_v51 }
 0x659   : > { %4977 = shalt.err (!%p4974_p7)
}
 0x65a   : > { %s4978_s15 = scalar_lea.hbm %s6305_s30, 16  ;;  %s4982_s13 = scalar_lea.hbm %s6358_s11, 32 }
 0x65b   : > { %p4979_p8 = scmp.ne.s32.totalorder %s6305_s30, %s4978_s15  ;;  %p4983_p1 = scmp.lt.u32.totalorder %s6305_s30, %s6358_s11 }
 0x65c   : > { %p4984_p0 = scmp.lt.u32.totalorder %s4982_s13, %s4978_s15  ;;  %p4986_p6 = scmp.lt.u32.totalorder %s4978_s15, %s6305_s30 }
 0x65d   : > { %p4980_p11 = pnand %p4979_p8, %p6370_p9 }
 0x65e   : > { %p4985_p5 = por %p4984_p0, %p4983_p1 }
 0x65f   : > { %p4981_p13 = pneg %p4980_p11 }
 0x660   : > { %p4987_p10 = por %p4986_p6, %p4985_p5 }
 0x662   : > { %p4988_p12 = pnand %p4987_p10, %p4981_p13 }
 0x664   : > { %4991 = shalt.err (!%p4988_p12)
}
 0x665   : > { %4883 = dma.vmem_to_hbm [thread:$0]  (%p6370_p9), %s6307_s12, 16, %s6305_s30, %s3576_s16  }
 0x666 PF: > { %p4895_p2 = scmp.ge.s32.totalorder %s5030_s20, 2  ;;  %s3600_s14 = sand.u32 1, %s5018_s17  }
 0x667   : > { %p6371_p3 = scmp.ne.s32.totalorder %s6364_s28, 0  ;;  %s3601_s22 = scalar_lea.sflag [#allocation6], %s3600_s14 }
 0x669   : > { %p4890_p4 = pnand %p4895_p2, %p6371_p3 }
 0x66b   : > { %5013 = dma.done.wait (!%p4890_p4), %s3601_s22, 16  }
 0x66c   : > { %5015 = vsyncadd (!%p4890_p4), %s3601_s22, 4294967280  ;;  %s6372_s24 = sld [smem:[#allocation10_spill]]  ;;  %p22_p7 = scmp.ge.s32.totalorder %s5124_s23, 4  }
 0x66d   : > { %s6373_s17 = smov %s5022_s18  ;;  %s6374_s18 = smov %s5026_s19 }
 0x66e   : > { %s6376_s20 = smov %s5124_s23  ;;  %24 = sbr.rel (!%p22_p7) target bundleno = 4 (0x4), region = 128 }
 0x672   : > { %s6375_s19 = smov %s6372_s24 }
 0x675   :  { %3605 = vsyncpa [#allocation5], 1 }
 0x676   :  { %3607 = vsyncpa [#allocation5 + $0x1], 1 }
 0x677   :  { %3608 = vsyncpa [#allocation6], 1 }
 0x678   :  { %3610 = vsyncpa [#allocation6 + $0x1], 1 }

</bundles_post_ra>
